<compile_context>
chip_gen: v5e
topology: v5e:2x2
jax: 0.10.0
libtpu: 0.0.40
codegen_flags: <defaults>
</compile_context>

<pallas_src>
import functools

import jax
import jax.numpy as jnp
from jax.experimental import pallas as pl
from jax.experimental.pallas import tpu as pltpu

EPS = 1e-5                    # BatchNorm eps (PyTorch default), training-mode stats
ACT_DTYPE = jnp.bfloat16      # HBM intermediates + MXU operands (BN math stays f32)


# ----------------------------------------------------------------------------
# Per-generation tiling / VMEM budget
# ----------------------------------------------------------------------------
def _vmem_budget_bytes():
    """Scoped-VMEM budget derived from the chip (item 6): ~112MiB v5e/v6e, ~48MiB v7x."""
    try:
        cap = int(pltpu.get_tpu_info().vmem_capacity_bytes)
    except Exception:
        cap = 128 * 1024 * 1024
    return int(min(cap - 16 * 1024 * 1024, 112 * 1024 * 1024))


def _pick_col_tile(bt, per_col_bytes, const_bytes, budget):
    """Largest multiple-of-128 divisor of bt whose (multi-buffered) working set fits."""
    avail = max(budget - const_bytes - (4 << 20), budget // 8)
    for t in (4096, 2048, 1024, 512, 256, 128):
        if bt % t == 0 and 3 * per_col_bytes * t <= avail:
            return t
    return bt   # correct (masked stores) fallback; pad B*T to a multiple of 128 upstream


# ----------------------------------------------------------------------------
# In-kernel helper: lane-dense per-row BN partial sums (item 9)
#   h: (R, T) f32 -> (2, R) f32 = [sum_t h, sum_t h^2] with R on the lane axis.
#   The time reduction is done on the MXU (ones-vector contraction) so the result
#   lands lane-dense without a transpose.
# ----------------------------------------------------------------------------
def _rowstats(h):
    ones = jnp.ones((1, h.shape[1]), jnp.float32)
    dn = (((1,), (1,)), ((), ()))
    s0 = jax.lax.dot_general(ones, h, dn, preferred_element_type=jnp.float32)
    s1 = jax.lax.dot_general(ones, h * h, dn, preferred_element_type=jnp.float32)
    return jnp.concatenate([s0, s1], axis=0)


# ----------------------------------------------------------------------------
# K1: graph aggregation + channel mix as ONE matmul + BN1 partial sums.
#     "fused" variant also applies the PREVIOUS layer's BN2+ReLU+identity-residual
#     epilogue as a prologue and materializes that layer's output (item 4).
# ----------------------------------------------------------------------------
def _k1_plain_kernel(w_ref, x_ref, h_ref, s_ref):
    h = jnp.dot(w_ref[...], x_ref[...], preferred_element_type=jnp.float32)
    h_ref[...] = h.astype(h_ref.dtype)
    s_ref[0] = _rowstats(h)


def _k1_fused_kernel(w_ref, h2_ref, sc_ref, sh_ref, res_ref, h_ref, s_ref, in_ref):
    x = jnp.maximum(h2_ref[...].astype(jnp.float32) * sc_ref[...] + sh_ref[...], 0.0)
    x = x + res_ref[...].astype(jnp.float32)         # previous layer identity residual
    xb = x.astype(in_ref.dtype)
    in_ref[...] = xb                                  # this layer's input (= next residual src)
    h = jnp.dot(w_ref[...], xb, preferred_element_type=jnp.float32)
    h_ref[...] = h.astype(h_ref.dtype)
    s_ref[0] = _rowstats(h)


def _call_k1_plain(W1, x, ct, vmem):
    R2, R1 = W1.shape
    bt = x.shape[1]
    nc = bt // ct
    return pl.pallas_call(
        _k1_plain_kernel,
        out_shape=(jax.ShapeDtypeStruct((R2, bt), ACT_DTYPE),
                   jax.ShapeDtypeStruct((nc, 2, R2), jnp.float32)),
        grid=(nc,),
        in_specs=[pl.BlockSpec((R2, R1), lambda c: (0, 0)),
                  pl.BlockSpec((R1, ct), lambda c: (0, c))],
        out_specs=(pl.BlockSpec((R2, ct), lambda c: (0, c)),
                   pl.BlockSpec((1, 2, R2), lambda c: (c, 0, 0))),
        compiler_params=pltpu.CompilerParams(
            dimension_semantics=("parallel",), vmem_limit_bytes=vmem),
    )(W1, x)


def _call_k1_fused(W1, h2p, scp, shp, resp, ct, vmem):
    R2, R1 = W1.shape
    bt = h2p.shape[1]
    nc = bt // ct
    return pl.pallas_call(
        _k1_fused_kernel,
        out_shape=(jax.ShapeDtypeStruct((R2, bt), ACT_DTYPE),
                   jax.ShapeDtypeStruct((nc, 2, R2), jnp.float32),
                   jax.ShapeDtypeStruct((R1, bt), ACT_DTYPE)),
        grid=(nc,),
        in_specs=[pl.BlockSpec((R2, R1), lambda c: (0, 0)),
                  pl.BlockSpec((R1, ct), lambda c: (0, c)),
                  pl.BlockSpec((R1, 1), lambda c: (0, 0)),
                  pl.BlockSpec((R1, 1), lambda c: (0, 0)),
                  pl.BlockSpec((R1, ct), lambda c: (0, c))],
        out_specs=(pl.BlockSpec((R2, ct), lambda c: (0, c)),
                   pl.BlockSpec((1, 2, R2), lambda c: (c, 0, 0)),
                   pl.BlockSpec((R1, ct), lambda c: (0, c))),
        compiler_params=pltpu.CompilerParams(
            dimension_semantics=("parallel",), vmem_limit_bytes=vmem),
    )(W1, h2p, scp, shp, resp)


# ----------------------------------------------------------------------------
# K2: BN1 apply + ReLU + temporal (k,1) conv per joint, with the RAW (k,C,C) taps
#     accumulated as k matmuls from one zero-padded copy (items 1, 2, 12).
# ----------------------------------------------------------------------------
def _k2_kernel(h1_ref, sc_ref, sh_ref, wt_ref, h2_ref, s_ref, *, k, pad):
    y = jnp.maximum(h1_ref[0].astype(jnp.float32) * sc_ref[...] + sh_ref[...], 0.0)
    C, T = y.shape
    yb = y.astype(wt_ref.dtype)
    if pad > 0:
        z = jnp.zeros((C, pad), dtype=yb.dtype)
        ypad = jnp.concatenate([z, yb, z], axis=1)            # (C, T + 2*pad)
    else:
        ypad = yb
    acc = jnp.dot(wt_ref[0], ypad[:, 0:T], preferred_element_type=jnp.float32)
    for dk in range(1, k):
        acc = acc + jnp.dot(wt_ref[dk], ypad[:, dk:dk + T],
                            preferred_element_type=jnp.float32)
    h2_ref[0] = acc.astype(h2_ref.dtype)
    s_ref[0, 0] = _rowstats(acc)


def _call_k2(h1_2d, scale1_col, shift1_col, Wt, B, V, T, vmem):
    k, C, _ = Wt.shape
    bt = h1_2d.shape[1]
    h1_3d = h1_2d.reshape(V, C, bt)                           # free per-joint view
    kern = functools.partial(_k2_kernel, k=k, pad=(k - 1) // 2)
    h2_3d, s2 = pl.pallas_call(
        kern,
        out_shape=(jax.ShapeDtypeStruct((V, C, bt), ACT_DTYPE),
                   jax.ShapeDtypeStruct((B, V, 2, C), jnp.float32)),
        grid=(B, V),
        in_specs=[pl.BlockSpec((1, C, T), lambda b, v: (v, 0, b)),
                  pl.BlockSpec((C, 1), lambda b, v: (0, 0)),
                  pl.BlockSpec((C, 1), lambda b, v: (0, 0)),
                  pl.BlockSpec((k, C, C), lambda b, v: (0, 0, 0))],
        out_specs=(pl.BlockSpec((1, C, T), lambda b, v: (v, 0, b)),
                   pl.BlockSpec((1, 1, 2, C), lambda b, v: (b, v, 0, 0))),
        compiler_params=pltpu.CompilerParams(
            dimension_semantics=("parallel", "parallel"), vmem_limit_bytes=vmem),
    )(h1_3d, scale1_col, shift1_col, Wt)
    return h2_3d.reshape(V * C, bt), s2


# ----------------------------------------------------------------------------
# Standalone epilogue (final layer / projection shortcut / no residual):
#   BN2 apply + ReLU + residual.  The projection variant is gridded per joint and
#   uses the raw (C_out, C_in) shortcut weight (item 10).
# ----------------------------------------------------------------------------
def _ep_none_kernel(h2_ref, sc_ref, sh_ref, o_ref):
    o_ref[...] = jnp.maximum(
        h2_ref[...].astype(jnp.float32) * sc_ref[...] + sh_ref[...], 0.0
    ).astype(o_ref.dtype)


def _ep_identity_kernel(h2_ref, sc_ref, sh_ref, res_ref, o_ref):
    y = jnp.maximum(h2_ref[...].astype(jnp.float32) * sc_ref[...] + sh_ref[...], 0.0)
    o_ref[...] = (y + res_ref[...].astype(jnp.float32)).astype(o_ref.dtype)


def _ep_proj_kernel(h2_ref, sc_ref, sh_ref, res_ref, ws_ref, bs_ref, o_ref):
    y = jnp.maximum(h2_ref[0].astype(jnp.float32) * sc_ref[...] + sh_ref[...], 0.0)
    r = jnp.dot(ws_ref[...], res_ref[0], preferred_element_type=jnp.float32) + bs_ref[...]
    o_ref[0] = (y + r).astype(o_ref.dtype)


def _call_ep_none(h2_2d, sc_rows, sh_rows, ct, vmem):
    R2, bt = h2_2d.shape
    nc = bt // ct
    return pl.pallas_call(
        _ep_none_kernel,
        out_shape=jax.ShapeDtypeStruct((R2, bt), ACT_DTYPE),
        grid=(nc,),
        in_specs=[pl.BlockSpec((R2, ct), lambda c: (0, c)),
                  pl.BlockSpec((R2, 1), lambda c: (0, 0)),
                  pl.BlockSpec((R2, 1), lambda c: (0, 0))],
        out_specs=pl.BlockSpec((R2, ct), lambda c: (0, c)),
        compiler_params=pltpu.CompilerParams(
            dimension_semantics=("parallel",), vmem_limit_bytes=vmem),
    )(h2_2d, sc_rows, sh_rows)


def _call_ep_identity(h2_2d, sc_rows, sh_rows, res_2d, ct, vmem):
    R2, bt = h2_2d.shape
    nc = bt // ct
    return pl.pallas_call(
        _ep_identity_kernel,
        out_shape=jax.ShapeDtypeStruct((R2, bt), ACT_DTYPE),
        grid=(nc,),
        in_specs=[pl.BlockSpec((R2, ct), lambda c: (0, c)),
                  pl.BlockSpec((R2, 1), lambda c: (0, 0)),
                  pl.BlockSpec((R2, 1), lambda c: (0, 0)),
                  pl.BlockSpec((R2, ct), lambda c: (0, c))],
        out_specs=pl.BlockSpec((R2, ct), lambda c: (0, c)),
        compiler_params=pltpu.CompilerParams(
            dimension_semantics=("parallel",), vmem_limit_bytes=vmem),
    )(h2_2d, sc_rows, sh_rows, res_2d)


def _call_ep_proj(h2_2d, scale2_col, shift2_col, res_2d, Ws, bs_col, V, ct, vmem):
    C_out, C_in = Ws.shape
    bt = h2_2d.shape[1]
    nc = bt // ct
    h2_3d = h2_2d.reshape(V, C_out, bt)
    res_3d = res_2d.reshape(V, C_in, bt)
    out = pl.pallas_call(
        _ep_proj_kernel,
        out_shape=jax.ShapeDtypeStruct((V, C_out, bt), ACT_DTYPE),
        grid=(V, nc),
        in_specs=[pl.BlockSpec((1, C_out, ct), lambda v, c: (v, 0, c)),
                  pl.BlockSpec((C_out, 1), lambda v, c: (0, 0)),
                  pl.BlockSpec((C_out, 1), lambda v, c: (0, 0)),
                  pl.BlockSpec((1, C_in, ct), lambda v, c: (v, 0, c)),
                  pl.BlockSpec((C_out, C_in), lambda v, c: (0, 0)),
                  pl.BlockSpec((C_out, 1), lambda v, c: (0, 0))],
        out_specs=pl.BlockSpec((1, C_out, ct), lambda v, c: (v, 0, c)),
        compiler_params=pltpu.CompilerParams(
            dimension_semantics=("parallel", "parallel"), vmem_limit_bytes=vmem),
    )(h2_3d, scale2_col, shift2_col, res_3d, Ws, bs_col)
    return out.reshape(V * C_out, bt)


# ----------------------------------------------------------------------------
# BN folding: global (training-mode) per-channel stats from the partial sums,
# folded with gamma/beta into one per-channel scale/shift (tiny, plain JAX).
# ----------------------------------------------------------------------------
def _fold_bn(stats_2c, gamma, beta, count):
    mean = stats_2c[0] / count
    var = jnp.maximum(stats_2c[1] / count - mean * mean, 0.0)   # clamp f32 cancellation
    scale = gamma * jax.lax.rsqrt(var + EPS)
    shift = beta - mean * scale
    return scale, shift        # (C,), (C,)


# ----------------------------------------------------------------------------
# Full forward: x (B, C, T) with C = num_joints * c_in  ->  (B, C_out, T, V)
# ----------------------------------------------------------------------------
def audio_pose_encoder_graph(x, params, A, c_in, num_joints, residual=True):
    B, C, T = x.shape
    V = num_joints
    assert C == V * c_in
    bt = B * T
    vmem = _vmem_budget_bytes()
    count = float(B * T * V)

    # (B, V*C_in, T) -> (V*C_in, B*T); rows (v, c) joint-major, cols (b, t)
    h = jnp.transpose(x, (1, 0, 2)).reshape(C, bt).astype(ACT_DTYPE)

    n_layers = len(params)
    pending = None          # deferred epilogue: (h2, sc2_rows, sh2_rows, layer_input)
    cur = h
    for li, lp in enumerate(params):
        P_, C_out, C_in_l = lp["Wc"].shape
        R1, R2 = V * C_in_l, V * C_out
        k = lp["Wt"].shape[0]

        # layer-constant weight folding (tiny, off the activation path)
        A_eff = A * lp["graph_w"]
        # W1[(v,o),(u,c)] = sum_p Wc[p,o,c] * A_eff[p,u,v]   (graph agg + channel mix)
        W1 = jnp.einsum("poc,puv->vouc", lp["Wc"], A_eff).reshape(R2, R1).astype(ACT_DTYPE)
        Wt = lp["Wt"].astype(ACT_DTYPE)                       # raw (k, C_out, C_out) taps
        # NOTE: per-part bc and temporal bt biases are dropped — training-mode BN's
        #       mean subtraction cancels them exactly.

        # ---- K1: graph conv (+ fused BN2/ReLU/identity-residual prologue, item 4) ----
        per_col = 2 * (R1 + R2) + (6 * R1 if pending is not None else 0)
        ct = _pick_col_tile(bt, per_col, 2 * R1 * R2, vmem)
        if pending is None:
            h1, s1 = _call_k1_plain(W1, cur, ct, vmem)
            layer_in = cur
        else:
            h1, s1, layer_in = _call_k1_fused(W1, *pending, ct, vmem)
        stats1 = s1.sum(axis=0).reshape(2, V, C_out).sum(axis=1)          # (2, C_out)
        scale1, shift1 = _fold_bn(stats1, lp["g1"], lp["b1"], count)

        # ---- K2: per-joint temporal conv (raw Wt, accumulated matmuls) --------------
        h2, s2 = _call_k2(h1, scale1[:, None], shift1[:, None], Wt, B, V, T, vmem)
        stats2 = s2.sum(axis=(0, 1))                                      # (2, C_out)
        scale2, shift2 = _fold_bn(stats2, lp["g2"], lp["b2"], count)

        # ---- epilogue: BN2 + ReLU + residual -----------------------------------------
        is_last = li == n_layers - 1
        identity_sc = residual and (lp["Ws"] is None)
        if identity_sc and not is_last:
            # defer: fused into the next layer's K1 (saves one HBM round trip + launch)
            sc_rows = jnp.tile(scale2, V)[:, None]
            sh_rows = jnp.tile(shift2, V)[:, None]
            pending = (h2, sc_rows, sh_rows, layer_in)
            cur = None
        else:
            ct_e = _pick_col_tile(bt, 2 * (2 * R2 + R1), 2 * R2 * R1, vmem)
            if not residual:
                sc_rows = jnp.tile(scale2, V)[:, None]
                sh_rows = jnp.tile(shift2, V)[:, None]
                cur = _call_ep_none(h2, sc_rows, sh_rows, ct_e, vmem)
            elif lp["Ws"] is None:
                sc_rows = jnp.tile(scale2, V)[:, None]
                sh_rows = jnp.tile(shift2, V)[:, None]
                cur = _call_ep_identity(h2, sc_rows, sh_rows, layer_in, ct_e, vmem)
            else:
                cur = _call_ep_proj(h2, scale2[:, None], shift2[:, None], layer_in,
                                    lp["Ws"].astype(ACT_DTYPE),
                                    lp["bs"][:, None].astype(jnp.float32),
                                    V, ct_e, vmem)
            pending = None

    C_out = params[-1]["Wc"].shape[1]
    out = cur.astype(jnp.float32).reshape(V, C_out, B, T)
    return jnp.transpose(out, (2, 1, 3, 0))                  # (B, C_out, T, V)


# ----------------------------------------------------------------------------
# Deterministic parameter init (shapes follow the PyTorch module __init__)
# ----------------------------------------------------------------------------
def init_params(key, layers_config, A):
    P, V, _ = A.shape
    layers = []
    for (c_in, c_out, k) in layers_config:
        key, *ks = jax.random.split(key, 7)
        lp = dict(
            graph_w=jnp.ones((P, V, V), jnp.float32),        # torch init: ones
            Wc=0.1 * jax.random.normal(ks[0], (P, c_out, c_in), jnp.float32),
            bc=0.1 * jax.random.normal(ks[1], (P, c_out), jnp.float32),
            g1=jnp.ones((c_out,), jnp.float32),
            b1=jnp.zeros((c_out,), jnp.float32),
            Wt=0.1 * jax.random.normal(ks[2], (k, c_out, c_out), jnp.float32),
            bt=0.1 * jax.random.normal(ks[3], (c_out,), jnp.float32),
            g2=jnp.ones((c_out,), jnp.float32),
            b2=jnp.zeros((c_out,), jnp.float32),
        )
        if c_in != c_out:
            lp["Ws"] = 0.1 * jax.random.normal(ks[4], (c_out, c_in), jnp.float32)
            lp["bs"] = 0.1 * jax.random.normal(ks[5], (c_out,), jnp.float32)
        else:
            lp["Ws"] = None
            lp["bs"] = None
        layers.append(lp)
    return layers


# ----------------------------------------------------------------------------
# Pure-JAX reference (mirrors the PyTorch forward, training-mode BN, f32)
# ----------------------------------------------------------------------------
def _ref_bn_relu(x, g, b):
    mean = x.mean(axis=(0, 2, 3), keepdims=True)
    var = ((x - mean) ** 2).mean(axis=(0, 2, 3), keepdims=True)
    xhat = (x - mean) / jnp.sqrt(var + EPS)
    return jnp.maximum(xhat * g.reshape(1, -1, 1, 1) + b.reshape(1, -1, 1, 1), 0.0)


def ref_layer(h, lp, A, residual=True):
    B, c_in, T, V = h.shape
    P = A.shape[0]
    c_out = lp["Wc"].shape[1]
    A_eff = A * lp["graph_w"]
    xf = h.reshape(B * c_in * T, V)
    acc = jnp.zeros((B, c_out, T, V), jnp.float32)
    for i in range(P):
        xi = (xf @ A_eff[i]).reshape(B, c_in, T, V)
        acc = acc + jnp.einsum("oc,bctv->botv", lp["Wc"][i], xi) \
            + lp["bc"][i].reshape(1, -1, 1, 1)
    acc = _ref_bn_relu(acc, lp["g1"], lp["b1"])
    k = lp["Wt"].shape[0]
    pd = (k - 1) // 2
    ap = jnp.pad(acc, ((0, 0), (0, 0), (pd, pd), (0, 0)))
    tc = jnp.zeros_like(acc)
    for dk in range(k):
        tc = tc + jnp.einsum("oc,bctv->botv", lp["Wt"][dk], ap[:, :, dk:dk + T, :])
    tc = tc + lp["bt"].reshape(1, -1, 1, 1)
    tc = _ref_bn_relu(tc, lp["g2"], lp["b2"])
    if residual:
        if lp["Ws"] is None:
            res = h
        else:
            res = jnp.einsum("oc,bctv->botv", lp["Ws"], h) + lp["bs"].reshape(1, -1, 1, 1)
        tc = tc + res
    return tc


def ref_forward(x, params, A, c_in, num_joints, residual=True):
    B, C, T = x.shape
    h = x.reshape(B, num_joints, c_in, T).transpose(0, 2, 3, 1)
    for lp in params:
        h = ref_layer(h, lp, A, residual=residual)
    return h


if __name__ == "__main__":
    B, V, C_in, T, P = 2, 5, 2, 128, 3
    # 3 layers so every kernel path is exercised:
    #   layer 0: projection shortcut  -> standalone per-joint epilogue (raw Ws)
    #   layer 1: identity shortcut    -> epilogue fused into layer 2's K1
    #   layer 2: identity shortcut, last -> standalone identity epilogue
    layers_config = [(C_in, 8, 3), (8, 8, 3), (8, 8, 3)]

    key = jax.random.PRNGKey(0)
    k_a, k_x, k_p = jax.random.split(key, 3)
    A = 0.3 * jnp.abs(jax.random.normal(k_a, (P, V, V), jnp.float32))
    x = jax.random.normal(k_x, (B, V * C_in, T), jnp.float32)   # (B, C, T)
    params = init_params(k_p, layers_config, A)

    fwd = jax.jit(functools.partial(audio_pose_encoder_graph,
                                    c_in=C_in, num_joints=V, residual=True))
    out = jax.block_until_ready(fwd(x, params, A))
    assert out.shape == (B, layers_config[-1][1], T, V), out.shape

    ref = ref_forward(x, params, A, C_in, V, residual=True)
    scale = float(jnp.max(jnp.abs(ref)))
    err = float(jnp.max(jnp.abs(out - ref)))
    mae = float(jnp.mean(jnp.abs(out - ref)))
    # bf16 intermediates: tolerance is relative to the activation scale
    assert err < 3e-2 * max(scale, 1.0), (err, scale)
    assert mae < 5e-3 * max(scale, 1.0), (mae, scale)

    print("KERNEL_OK")
</pallas_src>

<mosaic_0001>
module attributes {stable_mosaic.version = 11 : i64} {
  func.func @_k1_plain_kernel(%arg0: i32, %arg1: memref<40x10xbf16, #tpu.memory_space<vmem>>, %arg2: memref<10x256xbf16, #tpu.memory_space<vmem>>, %arg3: memref<40x256xbf16, #tpu.memory_space<vmem>>, %arg4: memref<1x2x40xf32, #tpu.memory_space<vmem>>) attributes {dimension_semantics = [#tpu.dimension_semantics<parallel>], iteration_bounds = array<i64: 1>, scalar_prefetch = 0 : i64, scratch_operands = 0 : i64, tpu.core_type = #tpu.core_type<tc>, window_params = [{pipeline_mode = #tpu.pipeline_mode<synchronous>, transform_indices = @transform_0, window_bounds = array<i64: 40, 10>}, {transform_indices = @transform_1, window_bounds = array<i64: 10, 256>}, {transform_indices = @transform_2, window_bounds = array<i64: 40, 256>}, {transform_indices = @transform_3, window_bounds = array<i64: 1, 2, 40>}]} {
    %c0 = arith.constant 0 : index
    %c0_0 = arith.constant 0 : index
    %0 = vector.load %arg1[%c0, %c0_0] : memref<40x10xbf16, #tpu.memory_space<vmem>>, vector<40x10xbf16>
    %c0_1 = arith.constant 0 : index
    %c0_2 = arith.constant 0 : index
    %1 = vector.load %arg2[%c0_1, %c0_2] : memref<10x256xbf16, #tpu.memory_space<vmem>>, vector<10x256xbf16>
    %cst = arith.constant dense<0.000000e+00> : vector<40x256xf32>
    %2 = tpu.matmul %0, %1, %cst {dimension_numbers = #tpu.dot_dimension_numbers<[1], [0], [0], [1], [0, 0, 1, 1], [], []>} : vector<40x10xbf16>, vector<10x256xbf16>, vector<40x256xf32> -> vector<40x256xf32>
    %3 = arith.truncf %2 : vector<40x256xf32> to vector<40x256xbf16>
    %c0_3 = arith.constant 0 : index
    %c0_4 = arith.constant 0 : index
    %4 = vector.load %arg3[%c0_3, %c0_4] : memref<40x256xbf16, #tpu.memory_space<vmem>>, vector<40x256xbf16>
    tpu.vector_store %arg3[%c0_3, %c0_4], %3 {strides = array<i32>} : memref<40x256xbf16, #tpu.memory_space<vmem>>, vector<40x256xbf16>,
    %cst_5 = arith.constant 1.000000e+00 : f32
    %5 = vector.broadcast %cst_5 : f32 to vector<1x256xf32>
    %cst_6 = arith.constant dense<0.000000e+00> : vector<1x40xf32>
    %6 = tpu.matmul %5, %2, %cst_6 {dimension_numbers = #tpu.dot_dimension_numbers<[1], [1], [0], [0], [0, 0, 1, 0], [], []>} : vector<1x256xf32>, vector<40x256xf32>, vector<1x40xf32> -> vector<1x40xf32>
    %7 = arith.mulf %2, %2 : vector<40x256xf32>
    %cst_7 = arith.constant dense<0.000000e+00> : vector<1x40xf32>
    %8 = tpu.matmul %5, %7, %cst_7 {dimension_numbers = #tpu.dot_dimension_numbers<[1], [1], [0], [0], [0, 0, 1, 0], [], []>} : vector<1x256xf32>, vector<40x256xf32>, vector<1x40xf32> -> vector<1x40xf32>
    %9 = tpu.concatenate %6, %8 in 0 : vector<1x40xf32>, vector<1x40xf32> -> vector<2x40xf32>
    %c0_8 = arith.constant 0 : index
    %c0_9 = arith.constant 0 : index
    %c0_10 = arith.constant 0 : index
    %10 = vector.load %arg4[%c0_8, %c0_9, %c0_10] : memref<1x2x40xf32, #tpu.memory_space<vmem>>, vector<1x2x40xf32>
    %11 = vector.shape_cast %10 : vector<1x2x40xf32> to vector<2x40xf32>
    %12 = vector.shape_cast %9 : vector<2x40xf32> to vector<1x2x40xf32>
    tpu.vector_store %arg4[%c0_8, %c0_9, %c0_10], %12 {strides = array<i32>} : memref<1x2x40xf32, #tpu.memory_space<vmem>>, vector<1x2x40xf32>,
    return
  }
  func.func @transform_0(%arg0: i32) -> (i32, i32) {
    %c0_i32 = arith.constant 0 : i32
    %c0_i32_0 = arith.constant 0 : i32
    %c0_i32_1 = arith.constant 0 : i32
    return %c0_i32, %c0_i32_0 : i32, i32
  }
  func.func @transform_1(%arg0: i32) -> (i32, i32) {
    %c0_i32 = arith.constant 0 : i32
    %c0_i32_0 = arith.constant 0 : i32
    return %c0_i32, %arg0 : i32, i32
  }
  func.func @transform_2(%arg0: i32) -> (i32, i32) {
    %c0_i32 = arith.constant 0 : i32
    %c0_i32_0 = arith.constant 0 : i32
    return %c0_i32, %arg0 : i32, i32
  }
  func.func @transform_3(%arg0: i32) -> (i32, i32, i32) {
    %c0_i32 = arith.constant 0 : i32
    %c0_i32_0 = arith.constant 0 : i32
    %c0_i32_1 = arith.constant 0 : i32
    return %arg0, %c0_i32, %c0_i32_0 : i32, i32, i32
  }
}

module attributes {stable_mosaic.version = 11 : i64} {
  func.func @_k2_kernel(%arg0: i32, %arg1: i32, %arg2: memref<1x8x128xbf16, #tpu.memory_space<vmem>>, %arg3: memref<8x1xf32, #tpu.memory_space<vmem>>, %arg4: memref<8x1xf32, #tpu.memory_space<vmem>>, %arg5: memref<3x8x8xbf16, #tpu.memory_space<vmem>>, %arg6: memref<1x8x128xbf16, #tpu.memory_space<vmem>>, %arg7: memref<1x1x2x8xf32, #tpu.memory_space<vmem>>) attributes {dimension_semantics = [#tpu.dimension_semantics<parallel>, #tpu.dimension_semantics<parallel>], iteration_bounds = array<i64: 2, 5>, scalar_prefetch = 0 : i64, scratch_operands = 0 : i64, tpu.core_type = #tpu.core_type<tc>, window_params = [{transform_indices = @transform_0, window_bounds = array<i64: 1, 8, 128>}, {pipeline_mode = #tpu.pipeline_mode<synchronous>, transform_indices = @transform_1, window_bounds = array<i64: 8, 1>}, {pipeline_mode = #tpu.pipeline_mode<synchronous>, transform_indices = @transform_2, window_bounds = array<i64: 8, 1>}, {pipeline_mode = #tpu.pipeline_mode<synchronous>, transform_indices = @transform_3, window_bounds = array<i64: 3, 8, 8>}, {transform_indices = @transform_4, window_bounds = array<i64: 1, 8, 128>}, {transform_indices = @transform_5, window_bounds = array<i64: 1, 1, 2, 8>}]} {
    %c0 = arith.constant 0 : index
    %c0_0 = arith.constant 0 : index
    %c0_1 = arith.constant 0 : index
    %0 = vector.load %arg2[%c0, %c0_0, %c0_1] : memref<1x8x128xbf16, #tpu.memory_space<vmem>>, vector<1x8x128xbf16>
    %1 = vector.shape_cast %0 : vector<1x8x128xbf16> to vector<8x128xbf16>
    %2 = arith.extf %1 : vector<8x128xbf16> to vector<8x128xf32>
    %c0_2 = arith.constant 0 : index
    %c0_3 = arith.constant 0 : index
    %3 = vector.load %arg3[%c0_2, %c0_3] : memref<8x1xf32, #tpu.memory_space<vmem>>, vector<8x1xf32>
    %4 = vector.broadcast %3 : vector<8x1xf32> to vector<8x128xf32>
    %5 = arith.mulf %2, %4 : vector<8x128xf32>
    %c0_4 = arith.constant 0 : index
    %c0_5 = arith.constant 0 : index
    %6 = vector.load %arg4[%c0_4, %c0_5] : memref<8x1xf32, #tpu.memory_space<vmem>>, vector<8x1xf32>
    %7 = vector.broadcast %6 : vector<8x1xf32> to vector<8x128xf32>
    %8 = arith.addf %5, %7 : vector<8x128xf32>
    %cst = arith.constant 0.000000e+00 : f32
    %9 = vector.broadcast %cst : f32 to vector<8x128xf32>
    %10 = arith.maximumf %8, %9 : vector<8x128xf32>
    %11 = arith.truncf %10 : vector<8x128xf32> to vector<8x128xbf16>
    %cst_6 = arith.constant 0.000000e+00 : bf16
    %12 = vector.broadcast %cst_6 : bf16 to vector<8x1xbf16>
    %13 = tpu.concatenate %12, %11, %12 in 1 : vector<8x1xbf16>, vector<8x128xbf16>, vector<8x1xbf16> -> vector<8x130xbf16>
    %c0_7 = arith.constant 0 : index
    %c0_8 = arith.constant 0 : index
    %c0_9 = arith.constant 0 : index
    %14 = vector.load %arg5[%c0_7, %c0_8, %c0_9] : memref<3x8x8xbf16, #tpu.memory_space<vmem>>, vector<1x8x8xbf16>
    %15 = vector.shape_cast %14 : vector<1x8x8xbf16> to vector<8x8xbf16>
    %16 = vector.extract_strided_slice %13 {offsets = [0, 0], sizes = [8, 128], strides = [1, 1]} : vector<8x130xbf16> to vector<8x128xbf16>
    %cst_10 = arith.constant dense<0.000000e+00> : vector<8x128xf32>
    %17 = tpu.matmul %15, %16, %cst_10 {dimension_numbers = #tpu.dot_dimension_numbers<[1], [0], [0], [1], [0, 0, 1, 1], [], []>} : vector<8x8xbf16>, vector<8x128xbf16>, vector<8x128xf32> -> vector<8x128xf32>
    %c1 = arith.constant 1 : index
    %c0_11 = arith.constant 0 : index
    %c0_12 = arith.constant 0 : index
    %18 = vector.load %arg5[%c1, %c0_11, %c0_12] : memref<3x8x8xbf16, #tpu.memory_space<vmem>>, vector<1x8x8xbf16>
    %19 = vector.shape_cast %18 : vector<1x8x8xbf16> to vector<8x8xbf16>
    %20 = vector.extract_strided_slice %13 {offsets = [0, 1], sizes = [8, 128], strides = [1, 1]} : vector<8x130xbf16> to vector<8x128xbf16>
    %cst_13 = arith.constant dense<0.000000e+00> : vector<8x128xf32>
    %21 = tpu.matmul %19, %20, %cst_13 {dimension_numbers = #tpu.dot_dimension_numbers<[1], [0], [0], [1], [0, 0, 1, 1], [], []>} : vector<8x8xbf16>, vector<8x128xbf16>, vector<8x128xf32> -> vector<8x128xf32>
    %22 = arith.addf %17, %21 : vector<8x128xf32>
    %c2 = arith.constant 2 : index
    %c0_14 = arith.constant 0 : index
    %c0_15 = arith.constant 0 : index
    %23 = vector.load %arg5[%c2, %c0_14, %c0_15] : memref<3x8x8xbf16, #tpu.memory_space<vmem>>, vector<1x8x8xbf16>
    %24 = vector.shape_cast %23 : vector<1x8x8xbf16> to vector<8x8xbf16>
    %25 = vector.extract_strided_slice %13 {offsets = [0, 2], sizes = [8, 128], strides = [1, 1]} : vector<8x130xbf16> to vector<8x128xbf16>
    %cst_16 = arith.constant dense<0.000000e+00> : vector<8x128xf32>
    %26 = tpu.matmul %24, %25, %cst_16 {dimension_numbers = #tpu.dot_dimension_numbers<[1], [0], [0], [1], [0, 0, 1, 1], [], []>} : vector<8x8xbf16>, vector<8x128xbf16>, vector<8x128xf32> -> vector<8x128xf32>
    %27 = arith.addf %22, %26 : vector<8x128xf32>
    %28 = arith.truncf %27 : vector<8x128xf32> to vector<8x128xbf16>
    %c0_17 = arith.constant 0 : index
    %c0_18 = arith.constant 0 : index
    %c0_19 = arith.constant 0 : index
    %29 = vector.load %arg6[%c0_17, %c0_18, %c0_19] : memref<1x8x128xbf16, #tpu.memory_space<vmem>>, vector<1x8x128xbf16>
    %30 = vector.shape_cast %29 : vector<1x8x128xbf16> to vector<8x128xbf16>
    %31 = vector.shape_cast %28 : vector<8x128xbf16> to vector<1x8x128xbf16>
    tpu.vector_store %arg6[%c0_17, %c0_18, %c0_19], %31 {strides = array<i32>} : memref<1x8x128xbf16, #tpu.memory_space<vmem>>, vector<1x8x128xbf16>,
    %cst_20 = arith.constant 1.000000e+00 : f32
    %32 = vector.broadcast %cst_20 : f32 to vector<1x128xf32>
    %cst_21 = arith.constant dense<0.000000e+00> : vector<1x8xf32>
    %33 = tpu.matmul %32, %27, %cst_21 {dimension_numbers = #tpu.dot_dimension_numbers<[1], [1], [0], [0], [0, 0, 1, 0], [], []>} : vector<1x128xf32>, vector<8x128xf32>, vector<1x8xf32> -> vector<1x8xf32>
    %34 = arith.mulf %27, %27 : vector<8x128xf32>
    %cst_22 = arith.constant dense<0.000000e+00> : vector<1x8xf32>
    %35 = tpu.matmul %32, %34, %cst_22 {dimension_numbers = #tpu.dot_dimension_numbers<[1], [1], [0], [0], [0, 0, 1, 0], [], []>} : vector<1x128xf32>, vector<8x128xf32>, vector<1x8xf32> -> vector<1x8xf32>
    %36 = tpu.concatenate %33, %35 in 0 : vector<1x8xf32>, vector<1x8xf32> -> vector<2x8xf32>
    %c0_23 = arith.constant 0 : index
    %c0_24 = arith.constant 0 : index
    %c0_25 = arith.constant 0 : index
    %c0_26 = arith.constant 0 : index
    %37 = vector.load %arg7[%c0_23, %c0_24, %c0_25, %c0_26] : memref<1x1x2x8xf32, #tpu.memory_space<vmem>>, vector<1x1x2x8xf32>
    %38 = vector.shape_cast %37 : vector<1x1x2x8xf32> to vector<2x8xf32>
    %39 = vector.shape_cast %36 : vector<2x8xf32> to vector<1x1x2x8xf32>
    tpu.vector_store %arg7[%c0_23, %c0_24, %c0_25, %c0_26], %39 {strides = array<i32>} : memref<1x1x2x8xf32, #tpu.memory_space<vmem>>, vector<1x1x2x8xf32>,
    return
  }
  func.func @transform_0(%arg0: i32, %arg1: i32) -> (i32, i32, i32) {
    %c0_i32 = arith.constant 0 : i32
    %c0_i32_0 = arith.constant 0 : i32
    return %arg1, %c0_i32, %arg0 : i32, i32, i32
  }
  func.func @transform_1(%arg0: i32, %arg1: i32) -> (i32, i32) {
    %c0_i32 = arith.constant 0 : i32
    %c0_i32_0 = arith.constant 0 : i32
    %c0_i32_1 = arith.constant 0 : i32
    return %c0_i32, %c0_i32_0 : i32, i32
  }
  func.func @transform_2(%arg0: i32, %arg1: i32) -> (i32, i32) {
    %c0_i32 = arith.constant 0 : i32
    %c0_i32_0 = arith.constant 0 : i32
    %c0_i32_1 = arith.constant 0 : i32
    return %c0_i32, %c0_i32_0 : i32, i32
  }
  func.func @transform_3(%arg0: i32, %arg1: i32) -> (i32, i32, i32) {
    %c0_i32 = arith.constant 0 : i32
    %c0_i32_0 = arith.constant 0 : i32
    %c0_i32_1 = arith.constant 0 : i32
    %c0_i32_2 = arith.constant 0 : i32
    return %c0_i32, %c0_i32_0, %c0_i32_1 : i32, i32, i32
  }
  func.func @transform_4(%arg0: i32, %arg1: i32) -> (i32, i32, i32) {
    %c0_i32 = arith.constant 0 : i32
    %c0_i32_0 = arith.constant 0 : i32
    return %arg1, %c0_i32, %arg0 : i32, i32, i32
  }
  func.func @transform_5(%arg0: i32, %arg1: i32) -> (i32, i32, i32, i32) {
    %c0_i32 = arith.constant 0 : i32
    %c0_i32_0 = arith.constant 0 : i32
    %c0_i32_1 = arith.constant 0 : i32
    return %arg0, %arg1, %c0_i32, %c0_i32_0 : i32, i32, i32, i32
  }
}

module attributes {stable_mosaic.version = 11 : i64} {
  func.func @_k1_plain_kernel(%arg0: i32, %arg1: memref<40x40xbf16, #tpu.memory_space<vmem>>, %arg2: memref<40x256xbf16, #tpu.memory_space<vmem>>, %arg3: memref<40x256xbf16, #tpu.memory_space<vmem>>, %arg4: memref<1x2x40xf32, #tpu.memory_space<vmem>>) attributes {dimension_semantics = [#tpu.dimension_semantics<parallel>], iteration_bounds = array<i64: 1>, scalar_prefetch = 0 : i64, scratch_operands = 0 : i64, tpu.core_type = #tpu.core_type<tc>, window_params = [{pipeline_mode = #tpu.pipeline_mode<synchronous>, transform_indices = @transform_0, window_bounds = array<i64: 40, 40>}, {transform_indices = @transform_1, window_bounds = array<i64: 40, 256>}, {transform_indices = @transform_2, window_bounds = array<i64: 40, 256>}, {transform_indices = @transform_3, window_bounds = array<i64: 1, 2, 40>}]} {
    %c0 = arith.constant 0 : index
    %c0_0 = arith.constant 0 : index
    %0 = vector.load %arg1[%c0, %c0_0] : memref<40x40xbf16, #tpu.memory_space<vmem>>, vector<40x40xbf16>
    %c0_1 = arith.constant 0 : index
    %c0_2 = arith.constant 0 : index
    %1 = vector.load %arg2[%c0_1, %c0_2] : memref<40x256xbf16, #tpu.memory_space<vmem>>, vector<40x256xbf16>
    %cst = arith.constant dense<0.000000e+00> : vector<40x256xf32>
    %2 = tpu.matmul %0, %1, %cst {dimension_numbers = #tpu.dot_dimension_numbers<[1], [0], [0], [1], [0, 0, 1, 1], [], []>} : vector<40x40xbf16>, vector<40x256xbf16>, vector<40x256xf32> -> vector<40x256xf32>
    %3 = arith.truncf %2 : vector<40x256xf32> to vector<40x256xbf16>
    %c0_3 = arith.constant 0 : index
    %c0_4 = arith.constant 0 : index
    %4 = vector.load %arg3[%c0_3, %c0_4] : memref<40x256xbf16, #tpu.memory_space<vmem>>, vector<40x256xbf16>
    tpu.vector_store %arg3[%c0_3, %c0_4], %3 {strides = array<i32>} : memref<40x256xbf16, #tpu.memory_space<vmem>>, vector<40x256xbf16>,
    %cst_5 = arith.constant 1.000000e+00 : f32
    %5 = vector.broadcast %cst_5 : f32 to vector<1x256xf32>
    %cst_6 = arith.constant dense<0.000000e+00> : vector<1x40xf32>
    %6 = tpu.matmul %5, %2, %cst_6 {dimension_numbers = #tpu.dot_dimension_numbers<[1], [1], [0], [0], [0, 0, 1, 0], [], []>} : vector<1x256xf32>, vector<40x256xf32>, vector<1x40xf32> -> vector<1x40xf32>
    %7 = arith.mulf %2, %2 : vector<40x256xf32>
    %cst_7 = arith.constant dense<0.000000e+00> : vector<1x40xf32>
    %8 = tpu.matmul %5, %7, %cst_7 {dimension_numbers = #tpu.dot_dimension_numbers<[1], [1], [0], [0], [0, 0, 1, 0], [], []>} : vector<1x256xf32>, vector<40x256xf32>, vector<1x40xf32> -> vector<1x40xf32>
    %9 = tpu.concatenate %6, %8 in 0 : vector<1x40xf32>, vector<1x40xf32> -> vector<2x40xf32>
    %c0_8 = arith.constant 0 : index
    %c0_9 = arith.constant 0 : index
    %c0_10 = arith.constant 0 : index
    %10 = vector.load %arg4[%c0_8, %c0_9, %c0_10] : memref<1x2x40xf32, #tpu.memory_space<vmem>>, vector<1x2x40xf32>
    %11 = vector.shape_cast %10 : vector<1x2x40xf32> to vector<2x40xf32>
    %12 = vector.shape_cast %9 : vector<2x40xf32> to vector<1x2x40xf32>
    tpu.vector_store %arg4[%c0_8, %c0_9, %c0_10], %12 {strides = array<i32>} : memref<1x2x40xf32, #tpu.memory_space<vmem>>, vector<1x2x40xf32>,
    return
  }
  func.func @transform_0(%arg0: i32) -> (i32, i32) {
    %c0_i32 = arith.constant 0 : i32
    %c0_i32_0 = arith.constant 0 : i32
    %c0_i32_1 = arith.constant 0 : i32
    return %c0_i32, %c0_i32_0 : i32, i32
  }
  func.func @transform_1(%arg0: i32) -> (i32, i32) {
    %c0_i32 = arith.constant 0 : i32
    %c0_i32_0 = arith.constant 0 : i32
    return %c0_i32, %arg0 : i32, i32
  }
  func.func @transform_2(%arg0: i32) -> (i32, i32) {
    %c0_i32 = arith.constant 0 : i32
    %c0_i32_0 = arith.constant 0 : i32
    return %c0_i32, %arg0 : i32, i32
  }
  func.func @transform_3(%arg0: i32) -> (i32, i32, i32) {
    %c0_i32 = arith.constant 0 : i32
    %c0_i32_0 = arith.constant 0 : i32
    %c0_i32_1 = arith.constant 0 : i32
    return %arg0, %c0_i32, %c0_i32_0 : i32, i32, i32
  }
}

module attributes {stable_mosaic.version = 11 : i64} {
  func.func @_ep_proj_kernel(%arg0: i32, %arg1: i32, %arg2: memref<1x8x256xbf16, #tpu.memory_space<vmem>>, %arg3: memref<8x1xf32, #tpu.memory_space<vmem>>, %arg4: memref<8x1xf32, #tpu.memory_space<vmem>>, %arg5: memref<1x2x256xbf16, #tpu.memory_space<vmem>>, %arg6: memref<8x2xbf16, #tpu.memory_space<vmem>>, %arg7: memref<8x1xf32, #tpu.memory_space<vmem>>, %arg8: memref<1x8x256xbf16, #tpu.memory_space<vmem>>) attributes {dimension_semantics = [#tpu.dimension_semantics<parallel>, #tpu.dimension_semantics<parallel>], iteration_bounds = array<i64: 5, 1>, scalar_prefetch = 0 : i64, scratch_operands = 0 : i64, tpu.core_type = #tpu.core_type<tc>, window_params = [{transform_indices = @transform_0, window_bounds = array<i64: 1, 8, 256>}, {pipeline_mode = #tpu.pipeline_mode<synchronous>, transform_indices = @transform_1, window_bounds = array<i64: 8, 1>}, {pipeline_mode = #tpu.pipeline_mode<synchronous>, transform_indices = @transform_2, window_bounds = array<i64: 8, 1>}, {transform_indices = @transform_3, window_bounds = array<i64: 1, 2, 256>}, {pipeline_mode = #tpu.pipeline_mode<synchronous>, transform_indices = @transform_4, window_bounds = array<i64: 8, 2>}, {pipeline_mode = #tpu.pipeline_mode<synchronous>, transform_indices = @transform_5, window_bounds = array<i64: 8, 1>}, {transform_indices = @transform_6, window_bounds = array<i64: 1, 8, 256>}]} {
    %c0 = arith.constant 0 : index
    %c0_0 = arith.constant 0 : index
    %c0_1 = arith.constant 0 : index
    %0 = vector.load %arg2[%c0, %c0_0, %c0_1] : memref<1x8x256xbf16, #tpu.memory_space<vmem>>, vector<1x8x256xbf16>
    %1 = vector.shape_cast %0 : vector<1x8x256xbf16> to vector<8x256xbf16>
    %2 = arith.extf %1 : vector<8x256xbf16> to vector<8x256xf32>
    %c0_2 = arith.constant 0 : index
    %c0_3 = arith.constant 0 : index
    %3 = vector.load %arg3[%c0_2, %c0_3] : memref<8x1xf32, #tpu.memory_space<vmem>>, vector<8x1xf32>
    %4 = vector.broadcast %3 : vector<8x1xf32> to vector<8x256xf32>
    %5 = arith.mulf %2, %4 : vector<8x256xf32>
    %c0_4 = arith.constant 0 : index
    %c0_5 = arith.constant 0 : index
    %6 = vector.load %arg4[%c0_4, %c0_5] : memref<8x1xf32, #tpu.memory_space<vmem>>, vector<8x1xf32>
    %7 = vector.broadcast %6 : vector<8x1xf32> to vector<8x256xf32>
    %8 = arith.addf %5, %7 : vector<8x256xf32>
    %cst = arith.constant 0.000000e+00 : f32
    %9 = vector.broadcast %cst : f32 to vector<8x256xf32>
    %10 = arith.maximumf %8, %9 : vector<8x256xf32>
    %c0_6 = arith.constant 0 : index
    %c0_7 = arith.constant 0 : index
    %11 = vector.load %arg6[%c0_6, %c0_7] : memref<8x2xbf16, #tpu.memory_space<vmem>>, vector<8x2xbf16>
    %c0_8 = arith.constant 0 : index
    %c0_9 = arith.constant 0 : index
    %c0_10 = arith.constant 0 : index
    %12 = vector.load %arg5[%c0_8, %c0_9, %c0_10] : memref<1x2x256xbf16, #tpu.memory_space<vmem>>, vector<1x2x256xbf16>
    %13 = vector.shape_cast %12 : vector<1x2x256xbf16> to vector<2x256xbf16>
    %cst_11 = arith.constant dense<0.000000e+00> : vector<8x256xf32>
    %14 = tpu.matmul %11, %13, %cst_11 {dimension_numbers = #tpu.dot_dimension_numbers<[1], [0], [0], [1], [0, 0, 1, 1], [], []>} : vector<8x2xbf16>, vector<2x256xbf16>, vector<8x256xf32> -> vector<8x256xf32>
    %c0_12 = arith.constant 0 : index
    %c0_13 = arith.constant 0 : index
    %15 = vector.load %arg7[%c0_12, %c0_13] : memref<8x1xf32, #tpu.memory_space<vmem>>, vector<8x1xf32>
    %16 = vector.broadcast %15 : vector<8x1xf32> to vector<8x256xf32>
    %17 = arith.addf %14, %16 : vector<8x256xf32>
    %18 = arith.addf %10, %17 : vector<8x256xf32>
    %19 = arith.truncf %18 : vector<8x256xf32> to vector<8x256xbf16>
    %c0_14 = arith.constant 0 : index
    %c0_15 = arith.constant 0 : index
    %c0_16 = arith.constant 0 : index
    %20 = vector.load %arg8[%c0_14, %c0_15, %c0_16] : memref<1x8x256xbf16, #tpu.memory_space<vmem>>, vector<1x8x256xbf16>
    %21 = vector.shape_cast %20 : vector<1x8x256xbf16> to vector<8x256xbf16>
    %22 = vector.shape_cast %19 : vector<8x256xbf16> to vector<1x8x256xbf16>
    tpu.vector_store %arg8[%c0_14, %c0_15, %c0_16], %22 {strides = array<i32>} : memref<1x8x256xbf16, #tpu.memory_space<vmem>>, vector<1x8x256xbf16>,
    return
  }
  func.func @transform_0(%arg0: i32, %arg1: i32) -> (i32, i32, i32) {
    %c0_i32 = arith.constant 0 : i32
    %c0_i32_0 = arith.constant 0 : i32
    return %arg0, %c0_i32, %arg1 : i32, i32, i32
  }
  func.func @transform_1(%arg0: i32, %arg1: i32) -> (i32, i32) {
    %c0_i32 = arith.constant 0 : i32
    %c0_i32_0 = arith.constant 0 : i32
    %c0_i32_1 = arith.constant 0 : i32
    return %c0_i32, %c0_i32_0 : i32, i32
  }
  func.func @transform_2(%arg0: i32, %arg1: i32) -> (i32, i32) {
    %c0_i32 = arith.constant 0 : i32
    %c0_i32_0 = arith.constant 0 : i32
    %c0_i32_1 = arith.constant 0 : i32
    return %c0_i32, %c0_i32_0 : i32, i32
  }
  func.func @transform_3(%arg0: i32, %arg1: i32) -> (i32, i32, i32) {
    %c0_i32 = arith.constant 0 : i32
    %c0_i32_0 = arith.constant 0 : i32
    return %arg0, %c0_i32, %arg1 : i32, i32, i32
  }
  func.func @transform_4(%arg0: i32, %arg1: i32) -> (i32, i32) {
    %c0_i32 = arith.constant 0 : i32
    %c0_i32_0 = arith.constant 0 : i32
    %c0_i32_1 = arith.constant 0 : i32
    return %c0_i32, %c0_i32_0 : i32, i32
  }
  func.func @transform_5(%arg0: i32, %arg1: i32) -> (i32, i32) {
    %c0_i32 = arith.constant 0 : i32
    %c0_i32_0 = arith.constant 0 : i32
    %c0_i32_1 = arith.constant 0 : i32
    return %c0_i32, %c0_i32_0 : i32, i32
  }
  func.func @transform_6(%arg0: i32, %arg1: i32) -> (i32, i32, i32) {
    %c0_i32 = arith.constant 0 : i32
    %c0_i32_0 = arith.constant 0 : i32
    return %arg0, %c0_i32, %arg1 : i32, i32, i32
  }
}

module attributes {stable_mosaic.version = 11 : i64} {
  func.func @_k1_fused_kernel(%arg0: i32, %arg1: memref<40x40xbf16, #tpu.memory_space<vmem>>, %arg2: memref<40x256xbf16, #tpu.memory_space<vmem>>, %arg3: memref<40x1xf32, #tpu.memory_space<vmem>>, %arg4: memref<40x1xf32, #tpu.memory_space<vmem>>, %arg5: memref<40x256xbf16, #tpu.memory_space<vmem>>, %arg6: memref<40x256xbf16, #tpu.memory_space<vmem>>, %arg7: memref<1x2x40xf32, #tpu.memory_space<vmem>>, %arg8: memref<40x256xbf16, #tpu.memory_space<vmem>>) attributes {dimension_semantics = [#tpu.dimension_semantics<parallel>], iteration_bounds = array<i64: 1>, scalar_prefetch = 0 : i64, scratch_operands = 0 : i64, tpu.core_type = #tpu.core_type<tc>, window_params = [{pipeline_mode = #tpu.pipeline_mode<synchronous>, transform_indices = @transform_0, window_bounds = array<i64: 40, 40>}, {transform_indices = @transform_1, window_bounds = array<i64: 40, 256>}, {pipeline_mode = #tpu.pipeline_mode<synchronous>, transform_indices = @transform_2, window_bounds = array<i64: 40, 1>}, {pipeline_mode = #tpu.pipeline_mode<synchronous>, transform_indices = @transform_3, window_bounds = array<i64: 40, 1>}, {transform_indices = @transform_4, window_bounds = array<i64: 40, 256>}, {transform_indices = @transform_5, window_bounds = array<i64: 40, 256>}, {transform_indices = @transform_6, window_bounds = array<i64: 1, 2, 40>}, {transform_indices = @transform_7, window_bounds = array<i64: 40, 256>}]} {
    %c0 = arith.constant 0 : index
    %c0_0 = arith.constant 0 : index
    %0 = vector.load %arg2[%c0, %c0_0] : memref<40x256xbf16, #tpu.memory_space<vmem>>, vector<40x256xbf16>
    %1 = arith.extf %0 : vector<40x256xbf16> to vector<40x256xf32>
    %c0_1 = arith.constant 0 : index
    %c0_2 = arith.constant 0 : index
    %2 = vector.load %arg3[%c0_1, %c0_2] : memref<40x1xf32, #tpu.memory_space<vmem>>, vector<40x1xf32>
    %3 = vector.broadcast %2 : vector<40x1xf32> to vector<40x256xf32>
    %4 = arith.mulf %1, %3 : vector<40x256xf32>
    %c0_3 = arith.constant 0 : index
    %c0_4 = arith.constant 0 : index
    %5 = vector.load %arg4[%c0_3, %c0_4] : memref<40x1xf32, #tpu.memory_space<vmem>>, vector<40x1xf32>
    %6 = vector.broadcast %5 : vector<40x1xf32> to vector<40x256xf32>
    %7 = arith.addf %4, %6 : vector<40x256xf32>
    %cst = arith.constant 0.000000e+00 : f32
    %8 = vector.broadcast %cst : f32 to vector<40x256xf32>
    %9 = arith.maximumf %7, %8 : vector<40x256xf32>
    %c0_5 = arith.constant 0 : index
    %c0_6 = arith.constant 0 : index
    %10 = vector.load %arg5[%c0_5, %c0_6] : memref<40x256xbf16, #tpu.memory_space<vmem>>, vector<40x256xbf16>
    %11 = arith.extf %10 : vector<40x256xbf16> to vector<40x256xf32>
    %12 = arith.addf %9, %11 : vector<40x256xf32>
    %13 = arith.truncf %12 : vector<40x256xf32> to vector<40x256xbf16>
    %c0_7 = arith.constant 0 : index
    %c0_8 = arith.constant 0 : index
    %14 = vector.load %arg8[%c0_7, %c0_8] : memref<40x256xbf16, #tpu.memory_space<vmem>>, vector<40x256xbf16>
    tpu.vector_store %arg8[%c0_7, %c0_8], %13 {strides = array<i32>} : memref<40x256xbf16, #tpu.memory_space<vmem>>, vector<40x256xbf16>,
    %c0_9 = arith.constant 0 : index
    %c0_10 = arith.constant 0 : index
    %15 = vector.load %arg1[%c0_9, %c0_10] : memref<40x40xbf16, #tpu.memory_space<vmem>>, vector<40x40xbf16>
    %cst_11 = arith.constant dense<0.000000e+00> : vector<40x256xf32>
    %16 = tpu.matmul %15, %13, %cst_11 {dimension_numbers = #tpu.dot_dimension_numbers<[1], [0], [0], [1], [0, 0, 1, 1], [], []>} : vector<40x40xbf16>, vector<40x256xbf16>, vector<40x256xf32> -> vector<40x256xf32>
    %17 = arith.truncf %16 : vector<40x256xf32> to vector<40x256xbf16>
    %c0_12 = arith.constant 0 : index
    %c0_13 = arith.constant 0 : index
    %18 = vector.load %arg6[%c0_12, %c0_13] : memref<40x256xbf16, #tpu.memory_space<vmem>>, vector<40x256xbf16>
    tpu.vector_store %arg6[%c0_12, %c0_13], %17 {strides = array<i32>} : memref<40x256xbf16, #tpu.memory_space<vmem>>, vector<40x256xbf16>,
    %cst_14 = arith.constant 1.000000e+00 : f32
    %19 = vector.broadcast %cst_14 : f32 to vector<1x256xf32>
    %cst_15 = arith.constant dense<0.000000e+00> : vector<1x40xf32>
    %20 = tpu.matmul %19, %16, %cst_15 {dimension_numbers = #tpu.dot_dimension_numbers<[1], [1], [0], [0], [0, 0, 1, 0], [], []>} : vector<1x256xf32>, vector<40x256xf32>, vector<1x40xf32> -> vector<1x40xf32>
    %21 = arith.mulf %16, %16 : vector<40x256xf32>
    %cst_16 = arith.constant dense<0.000000e+00> : vector<1x40xf32>
    %22 = tpu.matmul %19, %21, %cst_16 {dimension_numbers = #tpu.dot_dimension_numbers<[1], [1], [0], [0], [0, 0, 1, 0], [], []>} : vector<1x256xf32>, vector<40x256xf32>, vector<1x40xf32> -> vector<1x40xf32>
    %23 = tpu.concatenate %20, %22 in 0 : vector<1x40xf32>, vector<1x40xf32> -> vector<2x40xf32>
    %c0_17 = arith.constant 0 : index
    %c0_18 = arith.constant 0 : index
    %c0_19 = arith.constant 0 : index
    %24 = vector.load %arg7[%c0_17, %c0_18, %c0_19] : memref<1x2x40xf32, #tpu.memory_space<vmem>>, vector<1x2x40xf32>
    %25 = vector.shape_cast %24 : vector<1x2x40xf32> to vector<2x40xf32>
    %26 = vector.shape_cast %23 : vector<2x40xf32> to vector<1x2x40xf32>
    tpu.vector_store %arg7[%c0_17, %c0_18, %c0_19], %26 {strides = array<i32>} : memref<1x2x40xf32, #tpu.memory_space<vmem>>, vector<1x2x40xf32>,
    return
  }
  func.func @transform_0(%arg0: i32) -> (i32, i32) {
    %c0_i32 = arith.constant 0 : i32
    %c0_i32_0 = arith.constant 0 : i32
    %c0_i32_1 = arith.constant 0 : i32
    return %c0_i32, %c0_i32_0 : i32, i32
  }
  func.func @transform_1(%arg0: i32) -> (i32, i32) {
    %c0_i32 = arith.constant 0 : i32
    %c0_i32_0 = arith.constant 0 : i32
    return %c0_i32, %arg0 : i32, i32
  }
  func.func @transform_2(%arg0: i32) -> (i32, i32) {
    %c0_i32 = arith.constant 0 : i32
    %c0_i32_0 = arith.constant 0 : i32
    %c0_i32_1 = arith.constant 0 : i32
    return %c0_i32, %c0_i32_0 : i32, i32
  }
  func.func @transform_3(%arg0: i32) -> (i32, i32) {
    %c0_i32 = arith.constant 0 : i32
    %c0_i32_0 = arith.constant 0 : i32
    %c0_i32_1 = arith.constant 0 : i32
    return %c0_i32, %c0_i32_0 : i32, i32
  }
  func.func @transform_4(%arg0: i32) -> (i32, i32) {
    %c0_i32 = arith.constant 0 : i32
    %c0_i32_0 = arith.constant 0 : i32
    return %c0_i32, %arg0 : i32, i32
  }
  func.func @transform_5(%arg0: i32) -> (i32, i32) {
    %c0_i32 = arith.constant 0 : i32
    %c0_i32_0 = arith.constant 0 : i32
    return %c0_i32, %arg0 : i32, i32
  }
  func.func @transform_6(%arg0: i32) -> (i32, i32, i32) {
    %c0_i32 = arith.constant 0 : i32
    %c0_i32_0 = arith.constant 0 : i32
    %c0_i32_1 = arith.constant 0 : i32
    return %arg0, %c0_i32, %c0_i32_0 : i32, i32, i32
  }
  func.func @transform_7(%arg0: i32) -> (i32, i32) {
    %c0_i32 = arith.constant 0 : i32
    %c0_i32_0 = arith.constant 0 : i32
    return %c0_i32, %arg0 : i32, i32
  }
}

module attributes {stable_mosaic.version = 11 : i64} {
  func.func @_ep_identity_kernel(%arg0: i32, %arg1: memref<40x256xbf16, #tpu.memory_space<vmem>>, %arg2: memref<40x1xf32, #tpu.memory_space<vmem>>, %arg3: memref<40x1xf32, #tpu.memory_space<vmem>>, %arg4: memref<40x256xbf16, #tpu.memory_space<vmem>>, %arg5: memref<40x256xbf16, #tpu.memory_space<vmem>>) attributes {dimension_semantics = [#tpu.dimension_semantics<parallel>], iteration_bounds = array<i64: 1>, scalar_prefetch = 0 : i64, scratch_operands = 0 : i64, tpu.core_type = #tpu.core_type<tc>, window_params = [{transform_indices = @transform_0, window_bounds = array<i64: 40, 256>}, {pipeline_mode = #tpu.pipeline_mode<synchronous>, transform_indices = @transform_1, window_bounds = array<i64: 40, 1>}, {pipeline_mode = #tpu.pipeline_mode<synchronous>, transform_indices = @transform_2, window_bounds = array<i64: 40, 1>}, {transform_indices = @transform_3, window_bounds = array<i64: 40, 256>}, {transform_indices = @transform_4, window_bounds = array<i64: 40, 256>}]} {
    %c0 = arith.constant 0 : index
    %c0_0 = arith.constant 0 : index
    %0 = vector.load %arg1[%c0, %c0_0] : memref<40x256xbf16, #tpu.memory_space<vmem>>, vector<40x256xbf16>
    %1 = arith.extf %0 : vector<40x256xbf16> to vector<40x256xf32>
    %c0_1 = arith.constant 0 : index
    %c0_2 = arith.constant 0 : index
    %2 = vector.load %arg2[%c0_1, %c0_2] : memref<40x1xf32, #tpu.memory_space<vmem>>, vector<40x1xf32>
    %3 = vector.broadcast %2 : vector<40x1xf32> to vector<40x256xf32>
    %4 = arith.mulf %1, %3 : vector<40x256xf32>
    %c0_3 = arith.constant 0 : index
    %c0_4 = arith.constant 0 : index
    %5 = vector.load %arg3[%c0_3, %c0_4] : memref<40x1xf32, #tpu.memory_space<vmem>>, vector<40x1xf32>
    %6 = vector.broadcast %5 : vector<40x1xf32> to vector<40x256xf32>
    %7 = arith.addf %4, %6 : vector<40x256xf32>
    %cst = arith.constant 0.000000e+00 : f32
    %8 = vector.broadcast %cst : f32 to vector<40x256xf32>
    %9 = arith.maximumf %7, %8 : vector<40x256xf32>
    %c0_5 = arith.constant 0 : index
    %c0_6 = arith.constant 0 : index
    %10 = vector.load %arg4[%c0_5, %c0_6] : memref<40x256xbf16, #tpu.memory_space<vmem>>, vector<40x256xbf16>
    %11 = arith.extf %10 : vector<40x256xbf16> to vector<40x256xf32>
    %12 = arith.addf %9, %11 : vector<40x256xf32>
    %13 = arith.truncf %12 : vector<40x256xf32> to vector<40x256xbf16>
    %c0_7 = arith.constant 0 : index
    %c0_8 = arith.constant 0 : index
    %14 = vector.load %arg5[%c0_7, %c0_8] : memref<40x256xbf16, #tpu.memory_space<vmem>>, vector<40x256xbf16>
    tpu.vector_store %arg5[%c0_7, %c0_8], %13 {strides = array<i32>} : memref<40x256xbf16, #tpu.memory_space<vmem>>, vector<40x256xbf16>,
    return
  }
  func.func @transform_0(%arg0: i32) -> (i32, i32) {
    %c0_i32 = arith.constant 0 : i32
    %c0_i32_0 = arith.constant 0 : i32
    return %c0_i32, %arg0 : i32, i32
  }
  func.func @transform_1(%arg0: i32) -> (i32, i32) {
    %c0_i32 = arith.constant 0 : i32
    %c0_i32_0 = arith.constant 0 : i32
    %c0_i32_1 = arith.constant 0 : i32
    return %c0_i32, %c0_i32_0 : i32, i32
  }
  func.func @transform_2(%arg0: i32) -> (i32, i32) {
    %c0_i32 = arith.constant 0 : i32
    %c0_i32_0 = arith.constant 0 : i32
    %c0_i32_1 = arith.constant 0 : i32
    return %c0_i32, %c0_i32_0 : i32, i32
  }
  func.func @transform_3(%arg0: i32) -> (i32, i32) {
    %c0_i32 = arith.constant 0 : i32
    %c0_i32_0 = arith.constant 0 : i32
    return %c0_i32, %arg0 : i32, i32
  }
  func.func @transform_4(%arg0: i32) -> (i32, i32) {
    %c0_i32 = arith.constant 0 : i32
    %c0_i32_0 = arith.constant 0 : i32
    return %c0_i32, %arg0 : i32, i32
  }
}

</mosaic_0001>

<bundles_post_ra>
// kernel: audio_pose_encoder_graph.11
= control target key start
LH: loop header
LB: loop body
LE: loop exit
PB: predicated region body
PF: predicated region fallthrough
CT: control target
= control target key end

     0   :  { %vm72_vm0 = vcmask 1043456   ;;  %vm62_vm1 = vcmask 326656   ;;  %v277_v45 = vmov 1.0   ;;  %vm228_vm2 = vcmask 1040384   ;;  %s352_s1 = inlined_call_operand.vmem [shape: bf16[40,256], index: 1, kind: input, shape index: {}]   ;;  %s353_s0 = inlined_call_operand.vmem [shape: bf16[40,40], index: 0, kind: input, shape index: {}]   ;;  %s354_s2 = inlined_call_operand.vmem [shape: bf16[40,256], index: 2, kind: output, shape index: {0}]   ;;  %s355_s3 = inlined_call_operand.vmem [shape: f32[1,2,40], index: 3, kind: output, shape index: {1}]  }
   0x1   :  { %v23_v0 = vld [vmem:[%s352_s1 + $0x20] sm:$0xff]  ;;  %v258_v3 = vld [vmem:[%s352_s1 + $0x10] sm:$0xf]  ;;  %v275_v6 = vld [vmem:[%s352_s1 + $0x14] sm:$0xf0]  ;;  %vm230_vm3 = vcmask 320512  }
   0x2   :  { %v50_v1 = vunpack.c.l.b16 %v23_v0  ;;  %v51_v2 = vunpack.c.h.b16 %v23_v0  ;;  %v274_v7 = vld [vmem:[%s352_s1 + $0x14] sm:$0xf]  ;;  %v260_v8 = vld [vmem:[%s352_s1 + $0x18] sm:$0xf0]  ;;  %v259_v11 = vor.u32 %v275_v6, %v258_v3  ;;  %v250_v13 = vld [vmem:[%s352_s1] sm:$0xf] }
   0x3   :  { %v263_v12 = vor.u32 %v274_v7, %v260_v8  ;;  %v273_v14 = vld [vmem:[%s352_s1 + $0x4] sm:$0xf0]  ;;  %v272_v15 = vld [vmem:[%s352_s1 + $0x4] sm:$0xf]  ;;  %v252_v16 = vld [vmem:[%s352_s1 + $0x8] sm:$0xf0] }
   0x4   :  { %v56_v4 = vpack.c.b16 %v50_v1, %v50_v1  ;;  %v57_v5 = vpack.c.b16 %v51_v2, %v51_v2  ;;  %v251_v17 = vor.u32 %v273_v14, %v250_v13  ;;  %v255_v18 = vor.u32 %v272_v15, %v252_v16  ;;  %v270_v19 = vld [vmem:[%s353_s0] sm:$0xff]  ;;  %v271_v20 = vld [vmem:[%s353_s0 + $0x8] sm:$0xff]  ;;  %v18_v21 = vld [vmem:[%s353_s0 + $0x10] sm:$0xf] }
   0x5   :  { %v33_v22 = vunpack.c.l.b16 %v18_v21 }
   0x6   :  { %v74_v9 = vsel %vm72_vm0, %v56_v4, 0  ;;  %v77_v10 = vsel %vm72_vm0, %v57_v5, 0 }
   0x7   :  { %84 = vmatpush.bf16.msra.mxu0 %v74_v9  ;;  %107 = vmatpush.bf16.msra.mxu1 %v77_v10  ;;  %v36_v23 = vpack.c.b16 %v33_v22, %v33_v22 }
   0xb   :  { %85 = vmatpush.bf16.msra.mxu0 %v259_v11  ;;  %108 = vmatpush.bf16.msra.mxu1 %v263_v12 }
   0xf   :  { %86 = vmatpush.bf16.msra.mxu0 %v251_v17  ;;  %109 = vmatpush.bf16.msra.mxu1 %v255_v18 }
  0x12   :  { %264 = vmatmul.msk.bf16.vlgmr.msra.gmra.mxu0 %vm62_vm1, %v270_v19  ;;  %267 = vmatmul.msk.bf16.vlgmr.msra.gmra.mxu1 %vm62_vm1, %v270_v19 }
  0x22   :  { %265 = vmatmul.msk.bf16.gmra.mxu0 %vm62_vm1, %v271_v20  ;;  %268 = vmatmul.msk.bf16.gmra.mxu1 %vm62_vm1, %v271_v20 }
  0x32   :  { %266 = vmatmul.msk.bf16.gmra.mxu0 %vm62_vm1, %v36_v23  ;;  %269 = vmatmul.msk.bf16.gmra.mxu1 %vm62_vm1, %v36_v23 }
  0x8f   :  { %v88_v24 = vpop.f32.mrf.mxu0  ;;  %v111_v25 = vpop.f32.mrf.mxu1 }
  0x90   :  { %v125_v26 = vpack.c.bf16 %v111_v25, %v88_v24  ;;  %v175_v50 = vmul.f32 %v88_v24, %v88_v24  ;;  %v176_v51 = vmul.f32 %v111_v25, %v111_v25 }
  0x92   :  { %130 = vst [vmem:[%s354_s2] sm:$0xff] %v125_v26 }
  0x97   :  { %v90_v27 = vpop.f32.mrf.mxu0  ;;  %v113_v28 = vpop.f32.mrf.mxu1 }
  0x98   :  { %v126_v29 = vpack.c.bf16 %v113_v28, %v90_v27  ;;  %v177_v48 = vmul.f32 %v90_v27, %v90_v27  ;;  %v178_v49 = vmul.f32 %v113_v28, %v113_v28 }
  0x9a   :  { %131 = vst [vmem:[%s354_s2 + $0x8] sm:$0xff] %v126_v29 }
  0x9f   :  { %v93_v30 = vpop.f32.mrf.mxu0  ;;  %v116_v31 = vpop.f32.mrf.mxu1 }
  0xa0   :  { %v127_v32 = vpack.c.bf16 %v116_v31, %v93_v30  ;;  %v179_v46 = vmul.f32 %v93_v30, %v93_v30  ;;  %v180_v47 = vmul.f32 %v116_v31, %v116_v31 }
  0xa2   :  { %132 = vst [vmem:[%s354_s2 + $0x10] sm:$0xff] %v127_v32 }
  0xa7   :  { %v95_v33 = vpop.f32.mrf.mxu0  ;;  %v118_v34 = vpop.f32.mrf.mxu1 }
  0xa8   :  { %v128_v35 = vpack.c.bf16 %v118_v34, %v95_v33  ;;  %v181_v43 = vmul.f32 %v95_v33, %v95_v33  ;;  %v182_v44 = vmul.f32 %v118_v34, %v118_v34 }
  0xaa   :  { %133 = vst [vmem:[%s354_s2 + $0x18] sm:$0xff] %v128_v35 }
  0xaf   :  { %v98_v36 = vpop.f32.mrf.mxu0  ;;  %v121_v37 = vpop.f32.mrf.mxu1 }
  0xb0   :  { %v129_v38 = vpack.c.bf16 %v121_v37, %v98_v36  ;;  %146 = vmatpush.xpose.msra.mxu2 %v98_v36  ;;  %166 = vmatpush.xpose.msra.mxu3 %v121_v37  ;;  %v183_v41 = vmul.f32 %v98_v36, %v98_v36  ;;  %v184_v42 = vmul.f32 %v121_v37, %v121_v37 }
  0xb2   :  { %134 = vst [vmem:[%s354_s2 + $0x20] sm:$0xff] %v129_v38 }
  0xb4   :  { %147 = vmatpush.xpose.msra.mxu2 %v95_v33  ;;  %167 = vmatpush.xpose.msra.mxu3 %v118_v34 }
  0xb7   :  { %v100_v39 = vpop.f32.mrf.mxu0  ;;  %v123_v40 = vpop.f32.mrf.mxu1 }
  0xb8   :  { %148 = vmatpush.xpose.msra.mxu2 %v93_v30  ;;  %168 = vmatpush.xpose.msra.mxu3 %v116_v31 }
  0xbc   :  { %149 = vmatpush.xpose.msra.mxu2 %v90_v27  ;;  %169 = vmatpush.xpose.msra.mxu3 %v113_v28 }
  0xc0   :  { %150 = vmatpush.xpose.msra.mxu2 %v88_v24  ;;  %170 = vmatpush.xpose.msra.mxu3 %v111_v25 }
  0xc3   :  { %151 = vmatmul.f32.vlgmr.msra.gmra.mxu2 %v277_v45  ;;  %171 = vmatmul.f32.vlgmr.msra.gmra.mxu3 %v277_v45 }
  0xc4   :  { %196 = vmatpush.xpose.msrb.mxu2 %v183_v41  ;;  %216 = vmatpush.xpose.msrb.mxu3 %v184_v42 }
  0xc8   :  { %197 = vmatpush.xpose.msrb.mxu2 %v181_v43  ;;  %217 = vmatpush.xpose.msrb.mxu3 %v182_v44 }
  0xcc   :  { %198 = vmatpush.xpose.msrb.mxu2 %v179_v46  ;;  %218 = vmatpush.xpose.msrb.mxu3 %v180_v47 }
  0xd0   :  { %199 = vmatpush.xpose.msrb.mxu2 %v177_v48  ;;  %219 = vmatpush.xpose.msrb.mxu3 %v178_v49 }
  0xd4   :  { %200 = vmatpush.xpose.msrb.mxu2 %v175_v50  ;;  %220 = vmatpush.xpose.msrb.mxu3 %v176_v51 }
  0xd7   :  { %201 = vmatmul.f32.vlgmr.msrb.gmra.mxu2 %v277_v45  ;;  %221 = vmatmul.f32.vlgmr.msrb.gmra.mxu3 %v277_v45 }
 0x146   :  { %v152_v52 = vpop.f32.mrf.mxu2  ;;  %v172_v53 = vpop.f32.mrf.mxu3 }
 0x147   :  { %v173_v57 = vadd.f32 %v172_v53, %v152_v52 }
 0x15a   :  { %v202_v54 = vpop.f32.mrf.mxu2  ;;  %v222_v55 = vpop.f32.mrf.mxu3 }
 0x15b   :  { %v223_v56 = vadd.f32 %v222_v55, %v202_v54 }
 0x15d   :  { %v226_v58 = vrot.slane %v223_v56, 7 }
 0x15f   :  { %v229_v59 = vsel %vm228_vm2, %v173_v57, %v226_v58 }
 0x160   :  { %231 = vst.msk [vmem:[%s355_s3] sm:$0x3] %vm230_vm3, %v229_v59 }

// kernel: audio_pose_encoder_graph.8
= control target key start
LH: loop header
LB: loop body
LE: loop exit
PB: predicated region body
PF: predicated region fallthrough
CT: control target
= control target key end

     0   :  { %vm52_vm0 = vcmask 1044480   ;;  %vm42_vm1 = vcmask 80896   ;;  %v247_v33 = vmov 1.0   ;;  %vm208_vm2 = vcmask 1040384   ;;  %s307_s1 = inlined_call_operand.vmem [shape: bf16[10,256], index: 1, kind: input, shape index: {}]   ;;  %s308_s0 = inlined_call_operand.vmem [shape: bf16[40,10], index: 0, kind: input, shape index: {}]   ;;  %s309_s2 = inlined_call_operand.vmem [shape: bf16[40,256], index: 2, kind: output, shape index: {0}]   ;;  %s310_s3 = inlined_call_operand.vmem [shape: f32[1,2,40], index: 3, kind: output, shape index: {1}]  }
   0x1   :  { %v230_v0 = vld [vmem:[%s307_s1] sm:$0xf]  ;;  %v245_v1 = vld [vmem:[%s307_s1 + $0x4] sm:$0x10]  ;;  %v244_v2 = vld [vmem:[%s307_s1 + $0x4] sm:$0xf] }
   0x2   :  { %v231_v3 = vor.u32 %v245_v1, %v230_v0  ;;  %v232_v4 = vld [vmem:[%s307_s1 + $0x8] sm:$0x10]  ;;  %v242_v7 = vld [vmem:[%s308_s0] sm:$0xff]  ;;  %v18_v10 = vld [vmem:[%s308_s0 + $0x10] sm:$0xf]  ;;  %vm210_vm3 = vcmask 320512  }
   0x3   :  { %v235_v5 = vor.u32 %v244_v2, %v232_v4  ;;  %v243_v9 = vld [vmem:[%s308_s0 + $0x8] sm:$0xff]  ;;  %v30_v11 = vunpack.c.l.b16 %v18_v10 }
   0x4   :  { %v54_v6 = vsel %vm52_vm0, %v231_v3, 0 }
   0x5   :  { %66 = vmatpush.bf16.msra.mxu0 %v54_v6  ;;  %v57_v8 = vsel %vm52_vm0, %v235_v5, 0  ;;  %v33_v12 = vpack.c.b16 %v30_v11, %v30_v11 }
   0x6   :  { %89 = vmatpush.bf16.msra.mxu1 %v57_v8 }
   0x8   :  { %236 = vmatmul.msk.bf16.vlgmr.msra.gmra.mxu0 %vm42_vm1, %v242_v7 }
   0x9   :  { %239 = vmatmul.msk.bf16.vlgmr.msra.gmra.mxu1 %vm42_vm1, %v242_v7 }
  0x18   :  { %237 = vmatmul.msk.bf16.gmra.mxu0 %vm42_vm1, %v243_v9 }
  0x19   :  { %240 = vmatmul.msk.bf16.gmra.mxu1 %vm42_vm1, %v243_v9 }
  0x28   :  { %238 = vmatmul.msk.bf16.gmra.mxu0 %vm42_vm1, %v33_v12 }
  0x29   :  { %241 = vmatmul.msk.bf16.gmra.mxu1 %vm42_vm1, %v33_v12 }
  0x85   :  { %v68_v13 = vpop.f32.mrf.mxu0 }
  0x86   :  { %v91_v14 = vpop.f32.mrf.mxu1  ;;  %v155_v39 = vmul.f32 %v68_v13, %v68_v13 }
  0x87   :  { %v105_v15 = vpack.c.bf16 %v91_v14, %v68_v13  ;;  %v156_v40 = vmul.f32 %v91_v14, %v91_v14 }
  0x89   :  { %110 = vst [vmem:[%s309_s2] sm:$0xff] %v105_v15 }
  0x8d   :  { %v70_v16 = vpop.f32.mrf.mxu0 }
  0x8e   :  { %v93_v17 = vpop.f32.mrf.mxu1  ;;  %v157_v37 = vmul.f32 %v70_v16, %v70_v16 }
  0x8f   :  { %v106_v18 = vpack.c.bf16 %v93_v17, %v70_v16  ;;  %v158_v38 = vmul.f32 %v93_v17, %v93_v17 }
  0x91   :  { %111 = vst [vmem:[%s309_s2 + $0x8] sm:$0xff] %v106_v18 }
  0x95   :  { %v73_v19 = vpop.f32.mrf.mxu0 }
  0x96   :  { %v96_v20 = vpop.f32.mrf.mxu1  ;;  %v159_v35 = vmul.f32 %v73_v19, %v73_v19 }
  0x97   :  { %v107_v21 = vpack.c.bf16 %v96_v20, %v73_v19  ;;  %v160_v36 = vmul.f32 %v96_v20, %v96_v20 }
  0x99   :  { %112 = vst [vmem:[%s309_s2 + $0x10] sm:$0xff] %v107_v21 }
  0x9d   :  { %v75_v22 = vpop.f32.mrf.mxu0 }
  0x9e   :  { %v98_v23 = vpop.f32.mrf.mxu1  ;;  %v161_v32 = vmul.f32 %v75_v22, %v75_v22 }
  0x9f   :  { %v108_v24 = vpack.c.bf16 %v98_v23, %v75_v22  ;;  %v162_v34 = vmul.f32 %v98_v23, %v98_v23 }
  0xa1   :  { %113 = vst [vmem:[%s309_s2 + $0x18] sm:$0xff] %v108_v24 }
  0xa5   :  { %v78_v25 = vpop.f32.mrf.mxu0 }
  0xa6   :  { %v101_v26 = vpop.f32.mrf.mxu1  ;;  %126 = vmatpush.xpose.msra.mxu2 %v78_v25  ;;  %v163_v30 = vmul.f32 %v78_v25, %v78_v25 }
  0xa7   :  { %v109_v27 = vpack.c.bf16 %v101_v26, %v78_v25  ;;  %146 = vmatpush.xpose.msra.mxu3 %v101_v26  ;;  %v164_v31 = vmul.f32 %v101_v26, %v101_v26 }
  0xa9   :  { %114 = vst [vmem:[%s309_s2 + $0x20] sm:$0xff] %v109_v27 }
  0xaa   :  { %127 = vmatpush.xpose.msra.mxu2 %v75_v22 }
  0xab   :  { %147 = vmatpush.xpose.msra.mxu3 %v98_v23 }
  0xad   :  { %v80_v28 = vpop.f32.mrf.mxu0 }
  0xae   :  { %v103_v29 = vpop.f32.mrf.mxu1  ;;  %128 = vmatpush.xpose.msra.mxu2 %v73_v19 }
  0xaf   :  { %148 = vmatpush.xpose.msra.mxu3 %v96_v20 }
  0xb2   :  { %129 = vmatpush.xpose.msra.mxu2 %v70_v16 }
  0xb3   :  { %149 = vmatpush.xpose.msra.mxu3 %v93_v17 }
  0xb6   :  { %130 = vmatpush.xpose.msra.mxu2 %v68_v13 }
  0xb7   :  { %150 = vmatpush.xpose.msra.mxu3 %v91_v14 }
  0xb9   :  { %131 = vmatmul.f32.vlgmr.msra.gmra.mxu2 %v247_v33 }
  0xba   :  { %176 = vmatpush.xpose.msrb.mxu2 %v163_v30  ;;  %151 = vmatmul.f32.vlgmr.msra.gmra.mxu3 %v247_v33 }
  0xbb   :  { %196 = vmatpush.xpose.msrb.mxu3 %v164_v31 }
  0xbe   :  { %177 = vmatpush.xpose.msrb.mxu2 %v161_v32 }
  0xbf   :  { %197 = vmatpush.xpose.msrb.mxu3 %v162_v34 }
  0xc2   :  { %178 = vmatpush.xpose.msrb.mxu2 %v159_v35 }
  0xc3   :  { %198 = vmatpush.xpose.msrb.mxu3 %v160_v36 }
  0xc6   :  { %179 = vmatpush.xpose.msrb.mxu2 %v157_v37 }
  0xc7   :  { %199 = vmatpush.xpose.msrb.mxu3 %v158_v38 }
  0xca   :  { %180 = vmatpush.xpose.msrb.mxu2 %v155_v39 }
  0xcb   :  { %200 = vmatpush.xpose.msrb.mxu3 %v156_v40 }
  0xcd   :  { %181 = vmatmul.f32.vlgmr.msrb.gmra.mxu2 %v247_v33 }
  0xce   :  { %201 = vmatmul.f32.vlgmr.msrb.gmra.mxu3 %v247_v33 }
 0x13c   :  { %v132_v41 = vpop.f32.mrf.mxu2 }
 0x13d   :  { %v152_v42 = vpop.f32.mrf.mxu3 }
 0x13e   :  { %v153_v46 = vadd.f32 %v152_v42, %v132_v41 }
 0x150   :  { %v182_v43 = vpop.f32.mrf.mxu2 }
 0x151   :  { %v202_v44 = vpop.f32.mrf.mxu3 }
 0x152   :  { %v203_v45 = vadd.f32 %v202_v44, %v182_v43 }
 0x154   :  { %v206_v47 = vrot.slane %v203_v45, 7 }
 0x156   :  { %v209_v48 = vsel %vm208_vm2, %v153_v46, %v206_v47 }
 0x157   :  { %211 = vst.msk [vmem:[%s310_s3] sm:$0x3] %vm210_vm3, %v209_v48 }

// kernel: audio_pose_encoder_graph.9
= control target key start
LH: loop header
LB: loop body
LE: loop exit
PB: predicated region body
PF: predicated region fallthrough
CT: control target
= control target key end

     0   :  { %s706_s18 = smov 0   ;;  %s708_s19 = smov 0   ;;  %s796_s0 = inlined_call_operand.vmem [shape: bf16[5,8,256], index: 0, kind: input, shape index: {}]   ;;  %s797_s1 = inlined_call_operand.vmem [shape: f32[8,1], index: 1, kind: input, shape index: {}]   ;;  %s798_s2 = inlined_call_operand.vmem [shape: f32[8,1], index: 2, kind: input, shape index: {}]   ;;  %s799_s3 = inlined_call_operand.vmem [shape: bf16[3,8,8], index: 3, kind: input, shape index: {}]   ;;  %s800_s4 = inlined_call_operand.vmem [shape: bf16[5,8,256], index: 4, kind: output, shape index: {0}]   ;;  %s801_s5 = inlined_call_operand.vmem [shape: f32[2,5,2,8], index: 5, kind: output, shape index: {1}]  }
   0x1   :  { %s710_s20 = smov 0   ;;  %s712_s21 = smov 0  }
   0x2   :  { %s714_s22 = smov 0  }
   0x3 LB: > { %s25_s23 = sadd.s32 1, %s661_s20  ;;  %s28_s24 = sadd.s32 1, %s665_s21  ;;  %s669_s22 = sphi %s714_s22, %s16_s22   ;;  %s665_s21 = sphi %s712_s21, %s805_s21   ;;  %s661_s20 = sphi %s710_s20, %s804_s20   ;;  %s657_s19 = sphi %s708_s19, %s803_s19   ;;  %s653_s18 = sphi %s706_s18, %s802_s18  }
   0x4   : > { %p26_p0 = scmp.ge.s32.totalorder %s25_s23, 5  ;;  %p571_p1 = scmp.ge.s32.totalorder %s669_s22, 1 }
   0x5   : > { %p211_p2 = scmp.lt.s32.totalorder %s669_s22, 11 }
   0x6   : > { %s807_s23 = smov (%p26_p0, %s25_s23), 0  ;;  %s809_s24 = smov (!%p26_p0, %s28_s24), %s665_s21 }
   0x7   : > { %p212_p3 = pnand %p571_p1, %p211_p2  ;;  %p30_p4 = scmp.ge.s32.totalorder %s809_s24, 2 }
   0x8   : > { %p253_p5 = scmp.lt.s32.totalorder (!%p212_p3), %s653_s18, 4  ;;  %p255_p6 = scmp.lt.s32.totalorder (!%p212_p3), %s657_s19, 1 }
   0x9   : > { %s811_s24 = smov (%p30_p4, %s809_s24), 0  ;;  %215 = sbr.rel (%p212_p3) target bundleno = 667 (0x29b), region = 36 }
   0xa   : > { %s672_s10 = smov (!%p212_p3), 1   ;;  %s673_s11 = smov (!%p212_p3), 127  }
   0xb   : > { %s674_s12 = smov (!%p212_p3), 126  }
   0xe   : > { %v280_v0 = vld [vmem:[%s797_s1] sm:$0xff]  ;;  %v671_v1 = vmov 0   ;;  %s813_s18 = smov (!%p253_p5, %s653_s18), 4  ;;  %s815_s19 = smov (!%p255_p6, %s657_s19), 1  ;;  %vm301_vm0 = vcmask 7168   ;;  %vm321_vm1 = vcmask 1043456  }
   0xf   : > { %630 = vset.pattern.permute.xlu0 %v671_v1  ;;  %v287_v2 = vld [vmem:[%s798_s2] sm:$0xff]  ;;  %s572_s29 = sshll.u32 %s813_s18, 1  ;;  %vm317_vm2 = vcmask 64512   ;;  %vm315_vm3 = vcmask 1039360   ;;  %vm362_vm4 = vcmask 1031168   ;;  %v675_v37 = vmov 1.0  }
  0x10   : > { %283 = vperm.xlu0 %630, %v280_v0   ;;  %s748_s30 = sadd.s32 %s572_s29, %s815_s19  ;;  %v306_v17 = vld [vmem:[%s799_s3] sm:$0xf]  ;;  %v577_v26 = vld [vmem:[%s799_s3 + $0x4] sm:$0xf]  ;;  %v580_v27 = vld [vmem:[%s799_s3 + $0x8] sm:$0xf] }
  0x11   : > { %s573_s6 = sshll.u32 %s748_s30, 2  ;;  %s584_s29 = smul.u32 5, %s815_s19  ;;  %vm430_vm5 = vcmask 1040384   ;;  %vm432_vm6 = vcmask 58368  }
  0x12   : > { %s260_s9 = scalar_lea.vmem %s796_s0, %s573_s6  ;;  %s268_s28 = scalar_lea.vmem %s800_s4, %s573_s6 }
  0x13   : > { %v278_v4 = vld [vmem:[%s260_s9] sm:$0xf]  ;;  %s274_s7 = sadd.s32 %s584_s29, %s813_s18 }
  0x14   : > { %v279_v5 = vunpack.c.l.bf16 %v278_v4  ;;  %s576_s8 = sshll.u32 %s274_s7, 1 }
  0x18   : > { %290 = vperm.xlu0 %630, %v287_v2  }
  0x82   : > { %v284_v3 = vpop.permute.xlu0 %283 }
  0x83   : > { %v286_v6 = vmul.f32 %v284_v3, %v279_v5 }
  0x8a   : > { %v291_v7 = vpop.permute.xlu0 %290 }
  0x8b   : > { %v293_v8 = vadd.f32 %v291_v7, %v286_v6 }
  0x8d   : > { %v294_v9 = vmax.f32 %v293_v8, 0.0 }
  0x8f   : > { %v295_v10 = vpack.c.bf16 %v294_v9, %v294_v9 }
  0x91   : > { %v297_v11 = vunpack.c.l.b16 %v295_v10 }
  0x93   : > { %v298_v12 = vpack.c.b16 %v297_v11, %v297_v11 }
  0x95   : > { %299 = vrot.lane.b32.xlu1 %v298_v12, %s672_s10  ;;  %s276_s10 = scalar_lea.vmem %s801_s5, %s576_s8 }
 0x107   : > { %v300_v13 = vpop.permute.xlu1 %299 }
 0x108   : > { %v305_v14 = vsel %vm301_vm0, %v300_v13, 0  ;;  %v304_v15 = vsel %vm301_vm0, 0, %v300_v13 }
 0x109   : > { %313 = vrot.lane.b32.xlu0 %v305_v14, %s673_s11  ;;  %360 = vrot.lane.b32.xlu2 %v305_v14, %s674_s12  ;;  %v341_v16 = vsel %vm321_vm1, %v304_v15, 0 }
 0x10a   : > { %358 = vrot.lane.b32.xlu1 %v304_v15, %s674_s12  ;;  %350 = vmatpush.bf16.msra.mxu1 %v341_v16 }
 0x10d   : > { %579 = vmatmul.msk.bf16.vlgmr.msra.gmra.mxu1 %vm317_vm2, %v306_v17 }
 0x111   : > { %311 = vrot.lane.b32.xlu2 %v304_v15, %s673_s11 }
 0x163   : > { %v361_v18 = vpop.permute.xlu2 %360 }
 0x16b   : > { %v312_v19 = vpop.permute.xlu2 %311 }
 0x17b   : > { %v314_v20 = vpop.permute.xlu0 %313 }
 0x17c   : > { %v359_v21 = vpop.permute.xlu1 %358  ;;  %v316_v22 = vsel %vm315_vm3, %v312_v19, %v314_v20 }
 0x17d   : > { %v323_v23 = vsel %vm321_vm1, %v316_v22, 0  ;;  %v363_v24 = vsel %vm362_vm4, %v359_v21, %v361_v18 }
 0x17e   : > { %332 = vmatpush.bf16.msra.mxu0 %v323_v23  ;;  %v368_v25 = vsel %vm321_vm1, %v363_v24, 0 }
 0x17f   : > { %377 = vmatpush.bf16.msra.mxu2 %v368_v25 }
 0x181   : > { %578 = vmatmul.msk.bf16.vlgmr.msra.gmra.mxu0 %vm317_vm2, %v577_v26 }
 0x182   : > { %581 = vmatmul.msk.bf16.vlgmr.msra.gmra.mxu2 %vm317_vm2, %v580_v27 }
 0x18a   : > { %v352_v28 = vpop.f32.mrf.mxu1 }
 0x192   : > { %v354_v29 = vpop.f32.mrf.mxu1 }
 0x1fe   : > { %v334_v30 = vpop.f32.mrf.mxu0 }
 0x1ff   : > { %v353_v31 = vadd.f32 %v352_v28, %v334_v30 }
 0x205   : > { %v379_v32 = vpop.f32.mrf.mxu2 }
 0x206   : > { %v383_v33 = vadd.f32 %v379_v32, %v353_v31  ;;  %v336_v34 = vpop.f32.mrf.mxu0 }
 0x208   : > { %v384_v35 = vpack.c.bf16 %v383_v33, %v383_v33  ;;  %401 = vmatpush.xpose.msra.mxu3 %v383_v33  ;;  %v406_v36 = vmul.f32 %v383_v33, %v383_v33 }
 0x20a   : > { %385 = vst [vmem:[%s268_s28] sm:$0xf] %v384_v35 }
 0x20b   : > { %402 = vmatmul.f32.vlgmr.msra.gmra.mxu3 %v675_v37 }
 0x20c   : > { %422 = vmatpush.xpose.msrb.mxu3 %v406_v36 }
 0x20d   : > { %v381_v38 = vpop.f32.mrf.mxu2 }
 0x213   : > { %423 = vmatmul.f32.vlgmr.msrb.gmra.mxu3 %v675_v37 }
 0x28e   : > { %v403_v39 = vpop.f32.mrf.mxu3 }
 0x296   : > { %v424_v40 = vpop.f32.mrf.mxu3 }
 0x297   : > { %v428_v41 = vrot.slane %v424_v40, 7 }
 0x299   : > { %v431_v42 = vsel %vm430_vm5, %v403_v39, %v428_v41 }
 0x29a   : > { %433 = vst.msk [vmem:[%s276_s10] sm:$0x3] %vm432_vm6, %v431_v42 }
 0x29b PF: > { %s16_s22 = sadd.s32 1, %s669_s22   ;;  %s802_s18 = smov %s661_s20 }
 0x29c   : > { %p13_p7 = scmp.ge.s32.totalorder %s16_s22, 12   ;;  %s803_s19 = smov %s665_s21 }
 0x29d   : > { %s804_s20 = smov %s807_s23  ;;  %s805_s21 = smov %s811_s24 }
 0x29e   :  { %15 = sbr.rel (!%p13_p7) target bundleno = 3 (0x3), region = 80 }

// kernel: audio_pose_encoder_graph.10
= control target key start
LH: loop header
LB: loop body
LE: loop exit
PB: predicated region body
PF: predicated region fallthrough
CT: control target
= control target key end

     0   :  { %s602_s21 = smov 0   ;;  %s604_s22 = smov 0   ;;  %s654_s0 = inlined_call_operand.vmem [shape: bf16[5,8,256], index: 0, kind: input, shape index: {}]   ;;  %s655_s1 = inlined_call_operand.vmem [shape: f32[8,1], index: 1, kind: input, shape index: {}]   ;;  %s656_s2 = inlined_call_operand.vmem [shape: f32[8,1], index: 2, kind: input, shape index: {}]   ;;  %s657_s3 = inlined_call_operand.vmem [shape: bf16[5,2,256], index: 3, kind: input, shape index: {}]   ;;  %s658_s4 = inlined_call_operand.vmem [shape: bf16[8,2], index: 4, kind: input, shape index: {}]   ;;  %s659_s5 = inlined_call_operand.vmem [shape: f32[8,1], index: 5, kind: input, shape index: {}]   ;;  %s660_s6 = inlined_call_operand.vmem [shape: bf16[5,8,256], index: 6, kind: output, shape index: {}]  }
   0x1   :  { %s606_s23 = smov 0  }
   0x2 LB: > { %s28_s24 = sadd.s32 1, %s560_s22  ;;  %p503_p0 = scmp.ge.s32.totalorder %s564_s23, 1  ;;  %s564_s23 = sphi %s606_s23, %s16_s23   ;;  %s560_s22 = sphi %s604_s22, %s662_s22   ;;  %s556_s21 = sphi %s602_s21, %s661_s21  }
   0x3   : > { %p30_p1 = scmp.ge.s32.totalorder %s28_s24, 5  ;;  %p249_p2 = scmp.lt.s32.totalorder %s564_s23, 6 }
   0x5   : > { %s664_s24 = smov (%p30_p1, %s28_s24), 0  ;;  %p250_p3 = pnand %p503_p0, %p249_p2 }
   0x6   : > { %p296_p4 = scmp.lt.s32.totalorder (!%p250_p3), %s556_s21, 4 }
   0x7   : > { %253 = sbr.rel (%p250_p3) target bundleno = 162 (0xa2), region = 44 }
   0xc   : > { %v328_v0 = vld [vmem:[%s655_s1] sm:$0xff]  ;;  %v566_v1 = vmov 0   ;;  %s666_s21 = smov (!%p296_p4, %s556_s21), 4  ;;  %vm362_vm0 = vcmask 1040384   ;;  %vm358_vm1 = vcmask 15360  }
   0xd   : > { %540 = vset.pattern.permute.xlu0 %v566_v1  ;;  %541 = vset.pattern.permute.xlu1 %v566_v1  ;;  %v348_v2 = vld [vmem:[%s659_s5] sm:$0xff]  ;;  %s506_s29 = sshll.u32 %s666_s21, 1  ;;  %s513_s13 = sshll.u32 %s666_s21, 3 }
   0xe   : > { %331 = vperm.xlu0 %540, %v328_v0   ;;  %351 = vperm.xlu1 %541, %v348_v2   ;;  %s312_s8 = scalar_lea.vmem %s657_s3, %s506_s29  ;;  %v336_v4 = vld [vmem:[%s656_s2] sm:$0xff]  ;;  %s303_s16 = scalar_lea.vmem %s654_s0, %s513_s13 }
   0xf   : > { %v347_v3 = vld [vmem:[%s312_s8] sm:$0x3]  ;;  %s322_s19 = scalar_lea.vmem %s660_s6, %s513_s13 }
  0x10   : > { %355 = vst [vmem:[#allocation1] ss:$9 sm:$0xff] %v347_v3  ;;  %v346_v9 = vld [vmem:[%s658_s4] sm:$0xf] }
  0x11   : > { %v325_v11 = vld [vmem:[%s303_s16] sm:$0xff] }
  0x12   : > { %v326_v12 = vunpack.c.l.bf16 %v325_v11  ;;  %v327_v13 = vunpack.c.h.bf16 %v325_v11 }
  0x16   : > { %339 = vperm.xlu0 %540, %v336_v4  }
  0x17   : > { %v356_v5 = vld [vmem:[#allocation1] sm:$0xff]  ;;  %v357_v6 = vld [vmem:[#allocation1 + $0x9] sm:$0xff] }
  0x18   : > { %v363_v7 = vsel %vm362_vm0, %v356_v5, 0  ;;  %v365_v8 = vsel %vm362_vm0, %v357_v6, 0 }
  0x19   : > { %374 = vmatpush.bf16.msra.mxu0 %v363_v7  ;;  %387 = vmatpush.bf16.msra.mxu1 %v365_v8 }
  0x1c   : > { %509 = vmatmul.msk.bf16.vlgmr.msra.gmra.mxu0 %vm358_vm1, %v346_v9  ;;  %510 = vmatmul.msk.bf16.vlgmr.msra.gmra.mxu1 %vm358_vm1, %v346_v9 }
  0x80   : > { %v332_v10 = vpop.permute.xlu0 %331  ;;  %v352_v19 = vpop.permute.xlu1 %351 }
  0x81   : > { %v334_v14 = vmul.f32 %v332_v10, %v326_v12  ;;  %v335_v15 = vmul.f32 %v332_v10, %v327_v13 }
  0x88   : > { %v340_v16 = vpop.permute.xlu0 %339 }
  0x89   : > { %v342_v17 = vadd.f32 %v340_v16, %v334_v14  ;;  %v343_v18 = vadd.f32 %v340_v16, %v335_v15 }
  0x8b   : > { %v344_v22 = vmax.f32 %v342_v17, 0.0  ;;  %v345_v23 = vmax.f32 %v343_v18, 0.0 }
  0x99   : > { %v376_v20 = vpop.f32.mrf.mxu0  ;;  %v389_v21 = vpop.f32.mrf.mxu1 }
  0x9a   : > { %v377_v24 = vadd.f32 %v376_v20, %v352_v19  ;;  %v390_v25 = vadd.f32 %v389_v21, %v352_v19 }
  0x9c   : > { %v393_v26 = vadd.f32 %v377_v24, %v344_v22  ;;  %v394_v27 = vadd.f32 %v390_v25, %v345_v23 }
  0x9e   : > { %v395_v28 = vpack.c.bf16 %v394_v27, %v393_v26 }
  0xa0   : > { %396 = vst [vmem:[%s322_s19] sm:$0xff] %v395_v28 }
  0xa1   : > { %v378_v29 = vpop.f32.mrf.mxu0  ;;  %v391_v30 = vpop.f32.mrf.mxu1 }
  0xa2 PF: > { %s16_s23 = sadd.s32 1, %s564_s23   ;;  %s661_s21 = smov %s560_s22 }
  0xa3   : > { %p13_p5 = scmp.ge.s32.totalorder %s16_s23, 7   ;;  %s662_s22 = smov %s664_s24 }
  0xa5   :  { %15 = sbr.rel (!%p13_p5) target bundleno = 2 (0x2), region = 77 }

// kernel: tile.23
= control target key start
LH: loop header
LB: loop body
LE: loop exit
PB: predicated region body
PF: predicated region fallthrough
CT: control target
= control target key end

     0   :  { %s22_s0 = inlined_call_operand.vmem [shape: f32[8], index: 0, kind: input, shape index: {}]   ;;  %s23_s1 = inlined_call_operand.vmem [shape: f32[5,8], index: 1, kind: output, shape index: {}]  }
   0x1   :  { %v4_v0 = vld [vmem:[%s22_s0] ss:$0 sm:$0xff] }
   0x2   :  { %5 = vst [vmem:[%s23_s1] sm:$0xff] %v4_v0 }

// kernel: tile.0
= control target key start
LH: loop header
LB: loop body
LE: loop exit
PB: predicated region body
PF: predicated region fallthrough
CT: control target
= control target key end

     0   :  { %vm3_vm0 = vcmask 7168   ;;  %s85_s12 = smov 127   ;;  %s86_s13 = smov 125   ;;  %s190_s0 = inlined_call_operand.vmem [shape: f32[5,8], index: 0, kind: input, shape index: {}]   ;;  %s191_s1 = inlined_call_operand.vmem [shape: f32[40,1], index: 1, kind: output, shape index: {}]  }
   0x1   :  { %v7_v0 = vld [vmem:[%s190_s0] sm:$0x1f]   ;;  %s87_s20 = smov 123   ;;  %s88_s25 = smov 126  }
   0x2   :  { %v23_v1 = vld [vmem:[%s190_s0] sm:$0x1f]   ;;  %8 = vrot.lane.b32.xlu0 %v7_v0, %s85_s12  ;;  %s89_s26 = smov 124   ;;  %s90_s29 = smov 122  }
   0x3   :  { %v2_v2 = vld [vmem:[%s190_s0] sm:$0x1f]   ;;  %24 = vrot.lane.b32.xlu1 %v23_v1, %s86_s13 }
   0x4   :  { %4 = vst.msk [vmem:[%s191_s1] ss:$8 sm:$0xf] %vm3_vm0, %v2_v2   ;;  %v39_v3 = vld [vmem:[%s190_s0] sm:$0x1f]  }
   0x5   :  { %63 = vst.msk [vmem:[%s191_s1 + $0x1c] sm:$0x10] %vm3_vm0, %v2_v2   ;;  %40 = vrot.lane.b32.xlu2 %v39_v3, %s87_s20  ;;  %v15_v4 = vld [vmem:[%s190_s0] sm:$0x1f]  }
   0x6   :  { %v31_v5 = vld [vmem:[%s190_s0] sm:$0x1f]  }
   0x7   :  { %v47_v6 = vld [vmem:[%s190_s0] sm:$0x1f]  }
   0x8   :  { %v55_v7 = vld [vmem:[%s190_s0] sm:$0x1f]   ;;  %s91_s0 = smov 121  }
   0xa   :  { %16 = vrot.lane.b32.xlu0 %v15_v4, %s88_s25 }
   0xb   :  { %32 = vrot.lane.b32.xlu1 %v31_v5, %s89_s26 }
   0xd   :  { %48 = vrot.lane.b32.xlu2 %v47_v6, %s90_s29 }
  0x12   :  { %56 = vrot.lane.b32.xlu0 %v55_v7, %s91_s0 }
  0x5f   :  { %v41_v8 = vpop.permute.xlu2 %40  }
  0x60   :  { %72 = vst.msk [vmem:[%s191_s1 + $0x5] ss:$8 sm:$0xf] %vm3_vm0, %v41_v8  }
  0x61   :  { %73 = vst.msk [vmem:[%s191_s1 + $0x21] sm:$0x10] %vm3_vm0, %v41_v8  }
  0x67   :  { %v49_v9 = vpop.permute.xlu2 %48  }
  0x68   :  { %74 = vst.msk [vmem:[%s191_s1 + $0x6] ss:$8 sm:$0xf] %vm3_vm0, %v49_v9  }
  0x69   :  { %75 = vst.msk [vmem:[%s191_s1 + $0x22] sm:$0x10] %vm3_vm0, %v49_v9  }
  0x74   :  { %v9_v10 = vpop.permute.xlu0 %8  }
  0x75   :  { %v25_v11 = vpop.permute.xlu1 %24   ;;  %64 = vst.msk [vmem:[%s191_s1 + $0x1] ss:$8 sm:$0xf] %vm3_vm0, %v9_v10  }
  0x76   :  { %65 = vst.msk [vmem:[%s191_s1 + $0x1d] sm:$0x10] %vm3_vm0, %v9_v10  }
  0x77   :  { %68 = vst.msk [vmem:[%s191_s1 + $0x3] ss:$8 sm:$0xf] %vm3_vm0, %v25_v11  }
  0x78   :  { %69 = vst.msk [vmem:[%s191_s1 + $0x1f] sm:$0x10] %vm3_vm0, %v25_v11  }
  0x7c   :  { %v17_v12 = vpop.permute.xlu0 %16  }
  0x7d   :  { %v33_v13 = vpop.permute.xlu1 %32   ;;  %66 = vst.msk [vmem:[%s191_s1 + $0x2] ss:$8 sm:$0xf] %vm3_vm0, %v17_v12  }
  0x7e   :  { %67 = vst.msk [vmem:[%s191_s1 + $0x1e] sm:$0x10] %vm3_vm0, %v17_v12  }
  0x7f   :  { %70 = vst.msk [vmem:[%s191_s1 + $0x4] ss:$8 sm:$0xf] %vm3_vm0, %v33_v13  }
  0x80   :  { %71 = vst.msk [vmem:[%s191_s1 + $0x20] sm:$0x10] %vm3_vm0, %v33_v13  }
  0x84   :  { %v57_v14 = vpop.permute.xlu0 %56  }
  0x85   :  { %76 = vst.msk [vmem:[%s191_s1 + $0x7] ss:$8 sm:$0xf] %vm3_vm0, %v57_v14  }
  0x86   :  { %77 = vst.msk [vmem:[%s191_s1 + $0x23] sm:$0x10] %vm3_vm0, %v57_v14  }

// kernel: audio_pose_encoder_graph.15
= control target key start
LH: loop header
LB: loop body
LE: loop exit
PB: predicated region body
PF: predicated region fallthrough
CT: control target
= control target key end

     0   :  { %v165_v0 = vmov 0   ;;  %s270_s1 = inlined_call_operand.vmem [shape: f32[40,1], index: 1, kind: input, shape index: {}]   ;;  %s271_s2 = inlined_call_operand.vmem [shape: f32[40,1], index: 2, kind: input, shape index: {}]   ;;  %s272_s0 = inlined_call_operand.vmem [shape: bf16[40,256], index: 0, kind: input, shape index: {}]   ;;  %s273_s3 = inlined_call_operand.vmem [shape: bf16[40,256], index: 3, kind: input, shape index: {}]   ;;  %s274_s4 = inlined_call_operand.vmem [shape: bf16[40,256], index: 4, kind: output, shape index: {}]  }
   0x1   :  { %163 = vset.pattern.permute.xlu1 %v165_v0  ;;  %162 = vset.pattern.permute.xlu0 %v165_v0  ;;  %v34_v1 = vld [vmem:[%s270_s1 + $0x10] sm:$0xff]  ;;  %v32_v2 = vld [vmem:[%s270_s1] sm:$0xff]  ;;  %v35_v4 = vld [vmem:[%s270_s1 + $0x18] sm:$0xff] }
   0x2   :  { %49 = vperm.xlu1 %163, %v34_v1   ;;  %39 = vperm.xlu0 %162, %v32_v2   ;;  %v36_v3 = vld [vmem:[%s270_s1 + $0x20] sm:$0xff]  ;;  %v33_v5 = vld [vmem:[%s270_s1 + $0x8] sm:$0xff]  ;;  %v74_v7 = vld [vmem:[%s271_s2 + $0x10] sm:$0xff] }
   0x3   :  { %164 = vset.pattern.permute.xlu2 %v165_v0  ;;  %v72_v6 = vld [vmem:[%s271_s2] sm:$0xff]  ;;  %v73_v8 = vld [vmem:[%s271_s2 + $0x8] sm:$0xff]  ;;  %v75_v9 = vld [vmem:[%s271_s2 + $0x18] sm:$0xff] }
   0x4   :  { %59 = vperm.xlu2 %164, %v36_v3   ;;  %v76_v10 = vld [vmem:[%s271_s2 + $0x20] sm:$0xff]  ;;  %v20_v21 = vld [vmem:[%s272_s0 + $0x18] sm:$0xff]  ;;  %v19_v30 = vld [vmem:[%s272_s0 + $0x10] sm:$0xff] }
   0x5   :  { %v17_v12 = vld [vmem:[%s272_s0] sm:$0xff]  ;;  %v28_v28 = vunpack.c.l.bf16 %v20_v21  ;;  %v29_v29 = vunpack.c.h.bf16 %v20_v21  ;;  %v18_v33 = vld [vmem:[%s272_s0 + $0x8] sm:$0xff]  ;;  %v125_v34 = vld [vmem:[%s273_s3 + $0x18] sm:$0xff]  ;;  %v26_v40 = vunpack.c.l.bf16 %v19_v30  ;;  %v27_v41 = vunpack.c.h.bf16 %v19_v30 }
   0x6   :  { %v22_v13 = vunpack.c.l.bf16 %v17_v12  ;;  %v23_v14 = vunpack.c.h.bf16 %v17_v12  ;;  %v122_v17 = vld [vmem:[%s273_s3] sm:$0xff]  ;;  %v24_v43 = vunpack.c.l.bf16 %v18_v33  ;;  %v133_v44 = vunpack.c.l.bf16 %v125_v34  ;;  %v124_v51 = vld [vmem:[%s273_s3 + $0x10] sm:$0xff]  ;;  %v123_v52 = vld [vmem:[%s273_s3 + $0x8] sm:$0xff] }
   0x7   :  { %v127_v22 = vunpack.c.l.bf16 %v122_v17  ;;  %v128_v23 = vunpack.c.h.bf16 %v122_v17  ;;  %v134_v45 = vunpack.c.h.bf16 %v125_v34  ;;  %v25_v48 = vunpack.c.h.bf16 %v18_v33  ;;  %v21_v54 = vld [vmem:[%s272_s0 + $0x20] sm:$0xff] }
   0x8   :  { %v131_v60 = vunpack.c.l.bf16 %v124_v51  ;;  %v132_v61 = vunpack.c.h.bf16 %v124_v51  ;;  %v129_v63 = vunpack.c.l.bf16 %v123_v52 }
   0xa   :  { %54 = vperm.xlu1 %163, %v35_v4   ;;  %44 = vperm.xlu0 %162, %v33_v5   ;;  %v30_v5 = vunpack.c.l.bf16 %v21_v54 }
   0xc   :  { %79 = vperm.xlu2 %164, %v72_v6   ;;  %v130_v6 = vunpack.c.h.bf16 %v123_v52 }
  0x12   :  { %89 = vperm.xlu1 %163, %v74_v7   ;;  %84 = vperm.xlu0 %162, %v73_v8   ;;  %v31_v8 = vunpack.c.h.bf16 %v21_v54 }
  0x14   :  { %94 = vperm.xlu2 %164, %v75_v9  }
  0x1a   :  { %99 = vperm.xlu0 %162, %v76_v10  }
  0x5e   :  { %v221_v11 = vpop.permute.xlu2 %59 }
  0x66   :  { %v80_v15 = vpop.permute.xlu2 %79 }
  0x6e   :  { %v95_v42 = vpop.permute.xlu2 %94 }
  0x74   :  { %v50_v16 = vpop.permute.xlu1 %49  ;;  %v40_v18 = vpop.permute.xlu0 %39 }
  0x75   :  { %v62_v19 = vmul.f32 %v40_v18, %v22_v13  ;;  %v63_v20 = vmul.f32 %v40_v18, %v23_v14  ;;  %v66_v53 = vmul.f32 %v50_v16, %v26_v40  ;;  %v67_v55 = vmul.f32 %v50_v16, %v27_v41  ;;  %v126_v18 = vld [vmem:[%s273_s3 + $0x20] sm:$0xff] }
  0x77   :  { %v102_v24 = vadd.f32 %v80_v15, %v62_v19  ;;  %v103_v25 = vadd.f32 %v80_v15, %v63_v20  ;;  %v70_v19 = vmul.f32 %v221_v11, %v30_v5  ;;  %v71_v20 = vmul.f32 %v221_v11, %v31_v8 }
  0x79   :  { %v112_v26 = vmax.f32 %v102_v24, 0.0  ;;  %v113_v27 = vmax.f32 %v103_v25, 0.0  ;;  %v135_v24 = vunpack.c.l.bf16 %v126_v18  ;;  %v136_v25 = vunpack.c.h.bf16 %v126_v18 }
  0x7b   :  { %v137_v31 = vadd.f32 %v127_v22, %v112_v26  ;;  %v138_v32 = vadd.f32 %v128_v23, %v113_v27 }
  0x7c   :  { %v55_v35 = vpop.permute.xlu1 %54  ;;  %v45_v36 = vpop.permute.xlu0 %44 }
  0x7d   :  { %v147_v37 = vpack.c.bf16 %v138_v32, %v137_v31  ;;  %v68_v38 = vmul.f32 %v55_v35, %v28_v28  ;;  %v69_v39 = vmul.f32 %v55_v35, %v29_v29  ;;  %v64_v58 = vmul.f32 %v45_v36, %v24_v43 }
  0x7e   :  { %v65_v59 = vmul.f32 %v45_v36, %v25_v48 }
  0x7f   :  { %152 = vst [vmem:[%s274_s4] sm:$0xff] %v147_v37  ;;  %v108_v46 = vadd.f32 %v95_v42, %v68_v38  ;;  %v109_v47 = vadd.f32 %v95_v42, %v69_v39 }
  0x81   :  { %v118_v49 = vmax.f32 %v108_v46, 0.0  ;;  %v119_v50 = vmax.f32 %v109_v47, 0.0 }
  0x83   :  { %v143_v56 = vadd.f32 %v133_v44, %v118_v49  ;;  %v144_v57 = vadd.f32 %v134_v45, %v119_v50 }
  0x84   :  { %v90_v62 = vpop.permute.xlu1 %89  ;;  %v85_v0 = vpop.permute.xlu0 %84 }
  0x85   :  { %v150_v1 = vpack.c.bf16 %v144_v57, %v143_v56  ;;  %v106_v2 = vadd.f32 %v90_v62, %v66_v53  ;;  %v107_v3 = vadd.f32 %v90_v62, %v67_v55  ;;  %v104_v4 = vadd.f32 %v85_v0, %v64_v58 }
  0x86   :  { %v105_v7 = vadd.f32 %v85_v0, %v65_v59 }
  0x87   :  { %155 = vst [vmem:[%s274_s4 + $0x18] sm:$0xff] %v150_v1  ;;  %v116_v9 = vmax.f32 %v106_v2, 0.0  ;;  %v117_v10 = vmax.f32 %v107_v3, 0.0  ;;  %v114_v12 = vmax.f32 %v104_v4, 0.0 }
  0x88   :  { %v115_v13 = vmax.f32 %v105_v7, 0.0 }
  0x89   :  { %v141_v14 = vadd.f32 %v131_v60, %v116_v9  ;;  %v142_v15 = vadd.f32 %v132_v61, %v117_v10  ;;  %v139_v16 = vadd.f32 %v129_v63, %v114_v12 }
  0x8a   :  { %v140_v17 = vadd.f32 %v130_v6, %v115_v13 }
  0x8b   :  { %v149_v21 = vpack.c.bf16 %v142_v15, %v141_v14 }
  0x8c   :  { %v148_v22 = vpack.c.bf16 %v140_v17, %v139_v16  ;;  %v100_v23 = vpop.permute.xlu0 %99 }
  0x8d   :  { %154 = vst [vmem:[%s274_s4 + $0x10] sm:$0xff] %v149_v21  ;;  %v110_v26 = vadd.f32 %v100_v23, %v70_v19  ;;  %v111_v27 = vadd.f32 %v100_v23, %v71_v20 }
  0x8e   :  { %153 = vst [vmem:[%s274_s4 + $0x8] sm:$0xff] %v148_v22 }
  0x8f   :  { %v120_v28 = vmax.f32 %v110_v26, 0.0  ;;  %v121_v29 = vmax.f32 %v111_v27, 0.0 }
  0x91   :  { %v145_v30 = vadd.f32 %v135_v24, %v120_v28  ;;  %v146_v31 = vadd.f32 %v136_v25, %v121_v29 }
  0x93   :  { %v151_v11 = vpack.c.bf16 %v146_v31, %v145_v30 }
  0x95   :  { %156 = vst [vmem:[%s274_s4 + $0x20] sm:$0xff] %v151_v11 }

// kernel: audio_pose_encoder_graph.13
= control target key start
LH: loop header
LB: loop body
LE: loop exit
PB: predicated region body
PF: predicated region fallthrough
CT: control target
= control target key end

     0   :  { %v410_v0 = vmov 0   ;;  %vm217_vm0 = vcmask 1043456   ;;  %vm207_vm1 = vcmask 326656   ;;  %vm373_vm2 = vcmask 1040384   ;;  %s554_s2 = inlined_call_operand.vmem [shape: f32[40,1], index: 2, kind: input, shape index: {}]   ;;  %s555_s3 = inlined_call_operand.vmem [shape: f32[40,1], index: 3, kind: input, shape index: {}]   ;;  %s556_s1 = inlined_call_operand.vmem [shape: bf16[40,256], index: 1, kind: input, shape index: {}]   ;;  %s557_s4 = inlined_call_operand.vmem [shape: bf16[40,256], index: 4, kind: input, shape index: {}]   ;;  %s558_s7 = inlined_call_operand.vmem [shape: bf16[40,256], index: 7, kind: output, shape index: {2}]   ;;  %s559_s0 = inlined_call_operand.vmem [shape: bf16[40,40], index: 0, kind: input, shape index: {}]   ;;  %s560_s5 = inlined_call_operand.vmem [shape: bf16[40,256], index: 5, kind: output, shape index: {0}]   ;;  %s561_s6 = inlined_call_operand.vmem [shape: f32[1,2,40], index: 6, kind: output, shape index: {1}]  }
   0x1   :  { %408 = vset.pattern.permute.xlu1 %v410_v0  ;;  %407 = vset.pattern.permute.xlu0 %v410_v0  ;;  %v43_v1 = vld [vmem:[%s554_s2 + $0x20] sm:$0xff]  ;;  %v41_v2 = vld [vmem:[%s554_s2 + $0x10] sm:$0xff]  ;;  %v42_v5 = vld [vmem:[%s554_s2 + $0x18] sm:$0xff]  ;;  %vm375_vm3 = vcmask 320512  }
   0x2   :  { %66 = vperm.xlu0 %407, %v43_v1   ;;  %56 = vperm.xlu1 %408, %v41_v2   ;;  %v81_v3 = vld [vmem:[%s555_s3 + $0x10] sm:$0xff]  ;;  %v83_v4 = vld [vmem:[%s555_s3 + $0x20] sm:$0xff]  ;;  %v82_v6 = vld [vmem:[%s555_s3 + $0x18] sm:$0xff] }
   0x3   :  { %409 = vset.pattern.permute.xlu2 %v410_v0  ;;  %v40_v7 = vld [vmem:[%s554_s2 + $0x8] sm:$0xff]  ;;  %v39_v8 = vld [vmem:[%s554_s2] sm:$0xff]  ;;  %v26_v11 = vld [vmem:[%s556_s1 + $0x10] sm:$0xff] }
   0x4   :  { %96 = vperm.xlu2 %409, %v81_v3   ;;  %v79_v9 = vld [vmem:[%s555_s3] sm:$0xff]  ;;  %v80_v10 = vld [vmem:[%s555_s3 + $0x8] sm:$0xff]  ;;  %v33_v13 = vunpack.c.l.bf16 %v26_v11  ;;  %v34_v14 = vunpack.c.h.bf16 %v26_v11  ;;  %v131_v17 = vld [vmem:[%s557_s4 + $0x10] sm:$0xff] }
   0x5   :  { %v28_v15 = vld [vmem:[%s556_s1 + $0x20] sm:$0xff]  ;;  %v27_v23 = vld [vmem:[%s556_s1 + $0x18] sm:$0xff]  ;;  %v138_v24 = vunpack.c.l.bf16 %v131_v17  ;;  %v139_v25 = vunpack.c.h.bf16 %v131_v17  ;;  %v25_v61 = vld [vmem:[%s556_s1 + $0x8] sm:$0xff] }
   0x6   :  { %v37_v21 = vunpack.c.l.bf16 %v28_v15  ;;  %v38_v22 = vunpack.c.h.bf16 %v28_v15  ;;  %v133_v30 = vld [vmem:[%s557_s4 + $0x20] sm:$0xff]  ;;  %v35_v31 = vunpack.c.l.bf16 %v27_v23  ;;  %v36_v32 = vunpack.c.h.bf16 %v27_v23  ;;  %v132_v38 = vld [vmem:[%s557_s4 + $0x18] sm:$0xff] }
   0x7   :  { %v142_v39 = vunpack.c.l.bf16 %v133_v30  ;;  %v143_v40 = vunpack.c.h.bf16 %v133_v30  ;;  %v24_v47 = vld [vmem:[%s556_s1] sm:$0xff]  ;;  %v140_v48 = vunpack.c.l.bf16 %v132_v38  ;;  %v141_v49 = vunpack.c.h.bf16 %v132_v38 }
   0x8   :  { %v29_v55 = vunpack.c.l.bf16 %v24_v47  ;;  %v30_v56 = vunpack.c.h.bf16 %v24_v47  ;;  %v129_v1 = vld [vmem:[%s557_s4] sm:$0xff]  ;;  %v31_v3 = vunpack.c.l.bf16 %v25_v61 }
   0xa   :  { %106 = vperm.xlu0 %407, %v83_v4   ;;  %61 = vperm.xlu1 %408, %v42_v5   ;;  %v32_v4 = vunpack.c.h.bf16 %v25_v61 }
   0xc   :  { %101 = vperm.xlu2 %409, %v82_v6  }
  0x12   :  { %51 = vperm.xlu1 %408, %v40_v7   ;;  %46 = vperm.xlu0 %407, %v39_v8   ;;  %v134_v8 = vunpack.c.l.bf16 %v129_v1 }
  0x14   :  { %86 = vperm.xlu2 %409, %v79_v9  }
  0x1a   :  { %91 = vperm.xlu0 %407, %v80_v10  }
  0x5e   :  { %v97_v12 = vpop.permute.xlu2 %96 }
  0x66   :  { %v102_v33 = vpop.permute.xlu2 %101 }
  0x6e   :  { %v87_v7 = vpop.permute.xlu2 %86 }
  0x74   :  { %v67_v16 = vpop.permute.xlu0 %66  ;;  %v57_v18 = vpop.permute.xlu1 %56 }
  0x75   :  { %v73_v19 = vmul.f32 %v57_v18, %v33_v13  ;;  %v74_v20 = vmul.f32 %v57_v18, %v34_v14  ;;  %v77_v34 = vmul.f32 %v67_v16, %v37_v21  ;;  %v78_v35 = vmul.f32 %v67_v16, %v38_v22  ;;  %v130_v21 = vld [vmem:[%s557_s4 + $0x8] sm:$0xff] }
  0x76   :  { %v135_v13 = vunpack.c.h.bf16 %v129_v1 }
  0x77   :  { %v113_v26 = vadd.f32 %v97_v12, %v73_v19  ;;  %v114_v27 = vadd.f32 %v97_v12, %v74_v20 }
  0x79   :  { %v123_v28 = vmax.f32 %v113_v26, 0.0  ;;  %v124_v29 = vmax.f32 %v114_v27, 0.0 }
  0x7b   :  { %v148_v36 = vadd.f32 %v138_v24, %v123_v28  ;;  %v149_v37 = vadd.f32 %v139_v25, %v124_v29 }
  0x7c   :  { %v107_v41 = vpop.permute.xlu0 %106  ;;  %v62_v42 = vpop.permute.xlu1 %61 }
  0x7d   :  { %v117_v43 = vadd.f32 %v107_v41, %v77_v34  ;;  %v118_v44 = vadd.f32 %v107_v41, %v78_v35  ;;  %v75_v45 = vmul.f32 %v62_v42, %v35_v31  ;;  %v76_v46 = vmul.f32 %v62_v42, %v36_v32 }
  0x7e   :  { %v156_v50 = vpack.c.bf16 %v149_v37, %v148_v36  ;;  %v136_v31 = vunpack.c.l.bf16 %v130_v21  ;;  %v137_v32 = vunpack.c.h.bf16 %v130_v21 }
  0x7f   :  { %v127_v51 = vmax.f32 %v117_v43, 0.0  ;;  %v128_v52 = vmax.f32 %v118_v44, 0.0  ;;  %v115_v53 = vadd.f32 %v102_v33, %v75_v45  ;;  %v116_v54 = vadd.f32 %v102_v33, %v76_v46 }
  0x80   :  { %161 = vst [vmem:[%s558_s7 + $0x10] sm:$0xff] %v156_v50  ;;  %v191_v26 = vunpack.c.l.b16 %v156_v50  ;;  %v192_v30 = vunpack.c.h.b16 %v156_v50  ;;  %v403_v50 = vld [vmem:[%s559_s0] sm:$0xff] }
  0x81   :  { %v152_v57 = vadd.f32 %v142_v39, %v127_v51  ;;  %v153_v58 = vadd.f32 %v143_v40, %v128_v52  ;;  %v125_v59 = vmax.f32 %v115_v53, 0.0  ;;  %v126_v60 = vmax.f32 %v116_v54, 0.0  ;;  %v404_v51 = vld [vmem:[%s559_s0 + $0x8] sm:$0xff]  ;;  %v168_v52 = vld [vmem:[%s559_s0 + $0x10] sm:$0xf] }
  0x82   :  { %v178_v53 = vunpack.c.l.b16 %v168_v52 }
  0x83   :  { %v158_v62 = vpack.c.bf16 %v153_v58, %v152_v57  ;;  %v150_v63 = vadd.f32 %v140_v48, %v125_v59  ;;  %v151_v0 = vadd.f32 %v141_v49, %v126_v60 }
  0x84   :  { %v47_v2 = vpop.permute.xlu0 %46  ;;  %v52_v12 = vpop.permute.xlu1 %51  ;;  %v181_v54 = vpack.c.b16 %v178_v53, %v178_v53 }
  0x85   :  { %163 = vst [vmem:[%s558_s7 + $0x20] sm:$0xff] %v158_v62  ;;  %v69_v5 = vmul.f32 %v47_v2, %v29_v55  ;;  %v70_v6 = vmul.f32 %v47_v2, %v30_v56  ;;  %v195_v9 = vunpack.c.l.b16 %v158_v62  ;;  %v196_v10 = vunpack.c.h.b16 %v158_v62 }
  0x86   :  { %v157_v11 = vpack.c.bf16 %v151_v0, %v150_v63  ;;  %v71_v23 = vmul.f32 %v52_v12, %v31_v3  ;;  %v72_v27 = vmul.f32 %v52_v12, %v32_v4  ;;  %v411_v12 = vmov 1.0  }
  0x87   :  { %v109_v14 = vadd.f32 %v87_v7, %v69_v5  ;;  %v110_v15 = vadd.f32 %v87_v7, %v70_v6  ;;  %v201_v16 = vpack.c.b16 %v195_v9, %v195_v9  ;;  %v202_v17 = vpack.c.b16 %v196_v10, %v196_v10 }
  0x88   :  { %162 = vst [vmem:[%s558_s7 + $0x18] sm:$0xff] %v157_v11  ;;  %v193_v18 = vunpack.c.l.b16 %v157_v11  ;;  %v194_v22 = vunpack.c.h.b16 %v157_v11 }
  0x89   :  { %v119_v19 = vmax.f32 %v109_v14, 0.0  ;;  %v120_v20 = vmax.f32 %v110_v15, 0.0  ;;  %v219_v24 = vsel %vm217_vm0, %v201_v16, 0  ;;  %v222_v25 = vsel %vm217_vm0, %v202_v17, 0 }
  0x8a   :  { %229 = vmatpush.bf16.msra.mxu0 %v219_v24  ;;  %252 = vmatpush.bf16.msra.mxu1 %v222_v25  ;;  %v199_v34 = vpack.c.b16 %v193_v18, %v191_v26  ;;  %v200_v37 = vpack.c.b16 %v194_v22, %v192_v30 }
  0x8b   :  { %v144_v28 = vadd.f32 %v134_v8, %v119_v19  ;;  %v145_v29 = vadd.f32 %v135_v13, %v120_v20 }
  0x8c   :  { %v92_v33 = vpop.permute.xlu0 %91 }
  0x8d   :  { %v111_v35 = vadd.f32 %v92_v33, %v71_v23  ;;  %v112_v36 = vadd.f32 %v92_v33, %v72_v27  ;;  %v154_v38 = vpack.c.bf16 %v145_v29, %v144_v28 }
  0x8e   :  { %230 = vmatpush.bf16.msra.mxu0 %v199_v34  ;;  %253 = vmatpush.bf16.msra.mxu1 %v200_v37 }
  0x8f   :  { %v121_v39 = vmax.f32 %v111_v35, 0.0  ;;  %v122_v40 = vmax.f32 %v112_v36, 0.0  ;;  %159 = vst [vmem:[%s558_s7] sm:$0xff] %v154_v38  ;;  %v187_v44 = vunpack.c.l.b16 %v154_v38  ;;  %v188_v46 = vunpack.c.h.b16 %v154_v38 }
  0x91   :  { %v146_v41 = vadd.f32 %v136_v31, %v121_v39  ;;  %v147_v42 = vadd.f32 %v137_v32, %v122_v40 }
  0x93   :  { %v155_v43 = vpack.c.bf16 %v147_v42, %v146_v41 }
  0x95   :  { %160 = vst [vmem:[%s558_s7 + $0x8] sm:$0xff] %v155_v43  ;;  %v189_v45 = vunpack.c.l.b16 %v155_v43  ;;  %v190_v47 = vunpack.c.h.b16 %v155_v43 }
  0x97   :  { %v197_v48 = vpack.c.b16 %v189_v45, %v187_v44  ;;  %v198_v49 = vpack.c.b16 %v190_v47, %v188_v46 }
  0x99   :  { %231 = vmatpush.bf16.msra.mxu0 %v197_v48  ;;  %254 = vmatpush.bf16.msra.mxu1 %v198_v49 }
  0x9c   :  { %397 = vmatmul.msk.bf16.vlgmr.msra.gmra.mxu0 %vm207_vm1, %v403_v50  ;;  %400 = vmatmul.msk.bf16.vlgmr.msra.gmra.mxu1 %vm207_vm1, %v403_v50 }
  0xac   :  { %398 = vmatmul.msk.bf16.gmra.mxu0 %vm207_vm1, %v404_v51  ;;  %401 = vmatmul.msk.bf16.gmra.mxu1 %vm207_vm1, %v404_v51 }
  0xbc   :  { %399 = vmatmul.msk.bf16.gmra.mxu0 %vm207_vm1, %v181_v54  ;;  %402 = vmatmul.msk.bf16.gmra.mxu1 %vm207_vm1, %v181_v54 }
 0x119   :  { %v233_v55 = vpop.f32.mrf.mxu0  ;;  %v256_v56 = vpop.f32.mrf.mxu1 }
 0x11a   :  { %v270_v57 = vpack.c.bf16 %v256_v56, %v233_v55  ;;  %v320_v17 = vmul.f32 %v233_v55, %v233_v55  ;;  %v321_v18 = vmul.f32 %v256_v56, %v256_v56 }
 0x11c   :  { %275 = vst [vmem:[%s560_s5] sm:$0xff] %v270_v57 }
 0x121   :  { %v235_v58 = vpop.f32.mrf.mxu0  ;;  %v258_v59 = vpop.f32.mrf.mxu1 }
 0x122   :  { %v271_v60 = vpack.c.bf16 %v258_v59, %v235_v58  ;;  %v322_v15 = vmul.f32 %v235_v58, %v235_v58  ;;  %v323_v16 = vmul.f32 %v258_v59, %v258_v59 }
 0x124   :  { %276 = vst [vmem:[%s560_s5 + $0x8] sm:$0xff] %v271_v60 }
 0x129   :  { %v238_v61 = vpop.f32.mrf.mxu0  ;;  %v261_v62 = vpop.f32.mrf.mxu1 }
 0x12a   :  { %v272_v63 = vpack.c.bf16 %v261_v62, %v238_v61  ;;  %v324_v13 = vmul.f32 %v238_v61, %v238_v61  ;;  %v325_v14 = vmul.f32 %v261_v62, %v261_v62 }
 0x12c   :  { %277 = vst [vmem:[%s560_s5 + $0x10] sm:$0xff] %v272_v63 }
 0x131   :  { %v240_v0 = vpop.f32.mrf.mxu0  ;;  %v263_v1 = vpop.f32.mrf.mxu1 }
 0x132   :  { %v273_v2 = vpack.c.bf16 %v263_v1, %v240_v0  ;;  %v326_v10 = vmul.f32 %v240_v0, %v240_v0  ;;  %v327_v11 = vmul.f32 %v263_v1, %v263_v1 }
 0x134   :  { %278 = vst [vmem:[%s560_s5 + $0x18] sm:$0xff] %v273_v2 }
 0x139   :  { %v243_v3 = vpop.f32.mrf.mxu0  ;;  %v266_v4 = vpop.f32.mrf.mxu1 }
 0x13a   :  { %v274_v5 = vpack.c.bf16 %v266_v4, %v243_v3  ;;  %291 = vmatpush.xpose.msra.mxu2 %v243_v3  ;;  %311 = vmatpush.xpose.msra.mxu3 %v266_v4  ;;  %v328_v8 = vmul.f32 %v243_v3, %v243_v3  ;;  %v329_v9 = vmul.f32 %v266_v4, %v266_v4 }
 0x13c   :  { %279 = vst [vmem:[%s560_s5 + $0x20] sm:$0xff] %v274_v5 }
 0x13e   :  { %292 = vmatpush.xpose.msra.mxu2 %v240_v0  ;;  %312 = vmatpush.xpose.msra.mxu3 %v263_v1 }
 0x141   :  { %v245_v6 = vpop.f32.mrf.mxu0  ;;  %v268_v7 = vpop.f32.mrf.mxu1 }
 0x142   :  { %293 = vmatpush.xpose.msra.mxu2 %v238_v61  ;;  %313 = vmatpush.xpose.msra.mxu3 %v261_v62 }
 0x146   :  { %294 = vmatpush.xpose.msra.mxu2 %v235_v58  ;;  %314 = vmatpush.xpose.msra.mxu3 %v258_v59 }
 0x14a   :  { %295 = vmatpush.xpose.msra.mxu2 %v233_v55  ;;  %315 = vmatpush.xpose.msra.mxu3 %v256_v56 }
 0x14d   :  { %296 = vmatmul.f32.vlgmr.msra.gmra.mxu2 %v411_v12  ;;  %316 = vmatmul.f32.vlgmr.msra.gmra.mxu3 %v411_v12 }
 0x14e   :  { %341 = vmatpush.xpose.msrb.mxu2 %v328_v8  ;;  %361 = vmatpush.xpose.msrb.mxu3 %v329_v9 }
 0x152   :  { %342 = vmatpush.xpose.msrb.mxu2 %v326_v10  ;;  %362 = vmatpush.xpose.msrb.mxu3 %v327_v11 }
 0x156   :  { %343 = vmatpush.xpose.msrb.mxu2 %v324_v13  ;;  %363 = vmatpush.xpose.msrb.mxu3 %v325_v14 }
 0x15a   :  { %344 = vmatpush.xpose.msrb.mxu2 %v322_v15  ;;  %364 = vmatpush.xpose.msrb.mxu3 %v323_v16 }
 0x15e   :  { %345 = vmatpush.xpose.msrb.mxu2 %v320_v17  ;;  %365 = vmatpush.xpose.msrb.mxu3 %v321_v18 }
 0x161   :  { %346 = vmatmul.f32.vlgmr.msrb.gmra.mxu2 %v411_v12  ;;  %366 = vmatmul.f32.vlgmr.msrb.gmra.mxu3 %v411_v12 }
 0x1d0   :  { %v297_v19 = vpop.f32.mrf.mxu2  ;;  %v317_v20 = vpop.f32.mrf.mxu3 }
 0x1d1   :  { %v318_v24 = vadd.f32 %v317_v20, %v297_v19 }
 0x1e4   :  { %v347_v21 = vpop.f32.mrf.mxu2  ;;  %v367_v22 = vpop.f32.mrf.mxu3 }
 0x1e5   :  { %v368_v23 = vadd.f32 %v367_v22, %v347_v21 }
 0x1e7   :  { %v371_v25 = vrot.slane %v368_v23, 7 }
 0x1e9   :  { %v374_v26 = vsel %vm373_vm2, %v318_v24, %v371_v25 }
 0x1ea   :  { %376 = vst.msk [vmem:[%s561_s6] sm:$0x3] %vm375_vm3, %v374_v26 }

</bundles_post_ra>
